<compile_context>
chip_gen: v6e
topology: v6e:2x2x1
jax: 0.10.0
libtpu: 0.0.40
codegen_flags: <defaults>
</compile_context>

<pallas_src>
import jax
import jax.numpy as jnp
from jax.experimental import pallas as pl
from jax.experimental.pallas import tpu as pltpu

LANE = 128
SUBLANE = 8


def _round_up(x, m):
    return ((x + m - 1) // m) * m


def cnn_text_kernel(tok_ref, m_ref, bconv_ref, wfc_ref, bfc_ref, out_ref):
    # tok_ref:   (TB, L)            int32 token ids (batch tile)
    # m_ref:     (V_pad, 3*F_pad)   folded embed@conv weights, [M_0 | M_1 | M_2]
    # bconv_ref: (1, F_pad)
    # wfc_ref:   (F_pad, C_pad)
    # bfc_ref:   (1, C_pad)
    # out_ref:   (TB, C_pad)
    tok = tok_ref[...]                                   # (TB, L) int32
    TB, L = tok.shape
    v_pad = m_ref.shape[0]
    f_pad = m_ref.shape[1] // 3
    m = m_ref[...]                                       # load folded weights once

    lane_v = jax.lax.broadcasted_iota(jnp.int32, (TB, v_pad), 1)

    # Rolling window of the last 3 per-position products A_l = onehot_l @ [M_0|M_1|M_2].
    a_hist = [None, None, None]
    pooled = None
    for l in range(L):                                   # unrolled: L is small & static
        onehot = (lane_v == tok[:, l:l + 1]).astype(jnp.float32)          # (TB, V_pad)
        a_hist[l % 3] = jnp.dot(onehot, m, preferred_element_type=jnp.float32)
        if l >= 2:
            t = l - 2
            conv_t = (a_hist[t % 3][:, 0:f_pad]
                      + a_hist[(t + 1) % 3][:, f_pad:2 * f_pad]
                      + a_hist[(t + 2) % 3][:, 2 * f_pad:3 * f_pad])      # (TB, F_pad)
            pooled = conv_t if pooled is None else jnp.maximum(pooled, conv_t)

    # bias + ReLU AFTER the max-pool (exact: max commutes with a per-filter constant
    # add, ReLU is monotone) -> elementwise work on (TB, F_pad), not (TB*Lout, F_pad).
    pooled = jnp.maximum(pooled + bconv_ref[...], 0.0)
    # Dropout(0.5): identity at inference time (PyTorch eval semantics).
    # TODO(synk): training-mode dropout (pltpu.prng_random_bits mask) not implemented.
    out_ref[...] = (jnp.dot(pooled, wfc_ref[...],
                            preferred_element_type=jnp.float32) + bfc_ref[...])


def simple_cnn_text_classifier(tokens, embed_table, w_conv, b_conv, w_fc, b_fc,
                               *, batch_tile=None):
    """tokens: (B, L) int32.  Returns logits (B, C) float32."""
    B, L = tokens.shape
    if L < 3:
        raise ValueError("sequence length must be >= 3 (conv kernel height is 3)")
    V, E = embed_table.shape
    F = w_conv.shape[0]
    C = w_fc.shape[1]

    v_pad = _round_up(V, LANE)
    f_pad = _round_up(F, LANE)
    c_pad = _round_up(C, LANE)

    # Fold the embedding table into the conv weights (exact reassociation):
    #   M_k[v, f] = sum_e table[v, e] * Wconv[f, 0, k, e]
    # The kernel then never touches the gathered (B, L, E) activations at all.
    # TODO(synk): for vocabularies whose folded (V, 3*F) table does not fit VMEM
    # (notably on v7x's 64 MiB), fall back to memory_space=pl.ANY + manual DMA
    # row-gather instead of the VMEM-resident fold.
    w_k = jnp.transpose(w_conv[:, 0, :, :], (1, 2, 0)).astype(jnp.float32)    # (3, E, F)
    m3 = jnp.einsum("ve,kef->kvf", embed_table.astype(jnp.float32), w_k)      # (3, V, F)
    m3 = jnp.pad(m3, ((0, 0), (0, v_pad - V), (0, f_pad - F)))
    m_stack = jnp.concatenate([m3[0], m3[1], m3[2]], axis=1)                  # (V_pad, 3*F_pad)

    b_conv_p = jnp.pad(b_conv.reshape(1, F).astype(jnp.float32),
                       ((0, 0), (0, f_pad - F)))
    w_fc_p = jnp.pad(w_fc.astype(jnp.float32), ((0, f_pad - F), (0, c_pad - C)))
    b_fc_p = jnp.pad(b_fc.reshape(1, C).astype(jnp.float32),
                     ((0, 0), (0, c_pad - C)))

    # Batch tile: large tiles amortize the ~0.35 us/step overhead (per-sample VMEM
    # footprint here is ~2 KB, so 1024 rows fits easily even on v7x), always a
    # multiple of 8 for sublane-aligned output blocks, and >= 2 grid steps when
    # the batch allows (v7x has 2 TensorCores sharding the "parallel" axis).
    if batch_tile is None:
        if B <= SUBLANE:
            batch_tile = SUBLANE
        else:
            batch_tile = min(1024, _round_up(pl.cdiv(B, 2), SUBLANE))
    TB = _round_up(batch_tile, SUBLANE)
    B_pad = _round_up(B, TB)

    tok = tokens.astype(jnp.int32)
    if B_pad != B:
        tok = jnp.pad(tok, ((0, B_pad - B), (0, 0)))      # padded rows sliced off below

    out = pl.pallas_call(
        cnn_text_kernel,
        out_shape=jax.ShapeDtypeStruct((B_pad, c_pad), jnp.float32),
        grid_spec=pltpu.PrefetchScalarGridSpec(
            num_scalar_prefetch=0,
            grid=(B_pad // TB,),
            in_specs=[
                pl.BlockSpec((TB, L), lambda b: (b, 0)),
                # The four weight blocks below have constant index_maps, so Pallas
                # reuses the fetched block across grid steps.  (Single-buffering
                # them via pipeline_mode=pl.Buffered(1) would reclaim a few 100 KB
                # of VMEM; omitted to keep the call maximally portable.)
                pl.BlockSpec((v_pad, 3 * f_pad), lambda b: (0, 0)),
                pl.BlockSpec((1, f_pad), lambda b: (0, 0)),
                pl.BlockSpec((f_pad, c_pad), lambda b: (0, 0)),
                pl.BlockSpec((1, c_pad), lambda b: (0, 0)),
            ],
            out_specs=pl.BlockSpec((TB, c_pad), lambda b: (b, 0)),
        ),
        compiler_params=pltpu.CompilerParams(
            dimension_semantics=("parallel",),
            # Explicit VMEM budget with headroom: actual use is a few MiB even at
            # TB=1024, and 48 MiB stays under v7x's 64 MiB physical VMEM.
            vmem_limit_bytes=48 * 1024 * 1024,
        ),
    )(tok, m_stack, b_conv_p, w_fc_p, b_fc_p)
    return out[:B, :C]


def reference(tokens, embed_table, w_conv, b_conv, w_fc, b_fc):
    emb = jnp.take(embed_table, tokens, axis=0)                              # (B, L, E)
    B, L, E = emb.shape
    Lout = L - 2
    windows = jnp.stack([emb[:, k:k + Lout, :] for k in range(3)], axis=2)   # (B,Lout,3,E)
    conv = jnp.einsum("btke,foke->btf", windows, w_conv) + b_conv            # (B,Lout,F)
    conv = jnp.maximum(conv, 0.0)
    pooled = jnp.max(conv, axis=1)                                           # (B, F)
    return pooled @ w_fc + b_fc


if __name__ == "__main__":
    B, L = 2, 16
    vocab_size, embed_size = 100, 32
    num_filters, num_classes = 16, 4

    key = jax.random.PRNGKey(0)
    k_tok, k_emb, k_wc, k_bc, k_wf, k_bf = jax.random.split(key, 6)

    tokens = jax.random.randint(k_tok, (B, L), 0, vocab_size, dtype=jnp.int32)
    embed_table = jax.random.normal(k_emb, (vocab_size, embed_size), jnp.float32) * 0.1
    w_conv = jax.random.normal(k_wc, (num_filters, 1, 3, embed_size), jnp.float32) * 0.1
    b_conv = jax.random.normal(k_bc, (num_filters,), jnp.float32) * 0.1
    w_fc = jax.random.normal(k_wf, (num_filters, num_classes), jnp.float32) * 0.1
    b_fc = jax.random.normal(k_bf, (num_classes,), jnp.float32) * 0.1

    logits = simple_cnn_text_classifier(tokens, embed_table, w_conv, b_conv, w_fc, b_fc)
    jax.block_until_ready(logits)

    ref = reference(tokens, embed_table, w_conv, b_conv, w_fc, b_fc)
    assert logits.shape == (B, num_classes)
    assert jnp.allclose(logits, ref, atol=1e-4, rtol=1e-4), (logits, ref)
    print("KERNEL_OK")
</pallas_src>

<mosaic_0001>
module attributes {stable_mosaic.version = 11 : i64} {
  func.func @cnn_text_kernel(%arg0: i32, %arg1: memref<8x16xi32, #tpu.memory_space<vmem>>, %arg2: memref<128x384xf32, #tpu.memory_space<vmem>>, %arg3: memref<1x128xf32, #tpu.memory_space<vmem>>, %arg4: memref<128x128xf32, #tpu.memory_space<vmem>>, %arg5: memref<1x128xf32, #tpu.memory_space<vmem>>, %arg6: memref<8x128xf32, #tpu.memory_space<vmem>>) attributes {dimension_semantics = [#tpu.dimension_semantics<parallel>], iteration_bounds = array<i64: 1>, scalar_prefetch = 0 : i64, scratch_operands = 0 : i64, tpu.core_type = #tpu.core_type<tc>, window_params = [{transform_indices = @transform_0, window_bounds = array<i64: 8, 16>}, {pipeline_mode = #tpu.pipeline_mode<synchronous>, transform_indices = @transform_1, window_bounds = array<i64: 128, 384>}, {pipeline_mode = #tpu.pipeline_mode<synchronous>, transform_indices = @transform_2, window_bounds = array<i64: 1, 128>}, {pipeline_mode = #tpu.pipeline_mode<synchronous>, transform_indices = @transform_3, window_bounds = array<i64: 128, 128>}, {pipeline_mode = #tpu.pipeline_mode<synchronous>, transform_indices = @transform_4, window_bounds = array<i64: 1, 128>}, {transform_indices = @transform_5, window_bounds = array<i64: 8, 128>}]} {
    %c0 = arith.constant 0 : index
    %c0_0 = arith.constant 0 : index
    %0 = vector.load %arg1[%c0, %c0_0] : memref<8x16xi32, #tpu.memory_space<vmem>>, vector<8x16xi32>
    %c0_1 = arith.constant 0 : index
    %c0_2 = arith.constant 0 : index
    %1 = vector.load %arg2[%c0_1, %c0_2] : memref<128x384xf32, #tpu.memory_space<vmem>>, vector<128x384xf32>
    %2 = tpu.iota {dimensions = array<i32: 1>} : vector<8x128xi32>
    %3 = vector.extract_strided_slice %0 {offsets = [0, 0], sizes = [8, 1], strides = [1, 1]} : vector<8x16xi32> to vector<8x1xi32>
    %4 = vector.broadcast %3 : vector<8x1xi32> to vector<8x128xi32>
    %5 = arith.cmpi eq, %2, %4 : vector<8x128xi32>
    %6 = arith.extui %5 : vector<8x128xi1> to vector<8x128xi32>
    %7 = arith.sitofp %6 : vector<8x128xi32> to vector<8x128xf32>
    %cst = arith.constant dense<0.000000e+00> : vector<8x384xf32>
    %8 = tpu.matmul %7, %1, %cst {dimension_numbers = #tpu.dot_dimension_numbers<[1], [0], [0], [1], [0, 0, 1, 1], [], []>} : vector<8x128xf32>, vector<128x384xf32>, vector<8x384xf32> -> vector<8x384xf32>
    %9 = vector.extract_strided_slice %0 {offsets = [0, 1], sizes = [8, 1], strides = [1, 1]} : vector<8x16xi32> to vector<8x1xi32>
    %10 = vector.broadcast %9 : vector<8x1xi32> to vector<8x128xi32>
    %11 = arith.cmpi eq, %2, %10 : vector<8x128xi32>
    %12 = arith.extui %11 : vector<8x128xi1> to vector<8x128xi32>
    %13 = arith.sitofp %12 : vector<8x128xi32> to vector<8x128xf32>
    %cst_3 = arith.constant dense<0.000000e+00> : vector<8x384xf32>
    %14 = tpu.matmul %13, %1, %cst_3 {dimension_numbers = #tpu.dot_dimension_numbers<[1], [0], [0], [1], [0, 0, 1, 1], [], []>} : vector<8x128xf32>, vector<128x384xf32>, vector<8x384xf32> -> vector<8x384xf32>
    %15 = vector.extract_strided_slice %0 {offsets = [0, 2], sizes = [8, 1], strides = [1, 1]} : vector<8x16xi32> to vector<8x1xi32>
    %16 = vector.broadcast %15 : vector<8x1xi32> to vector<8x128xi32>
    %17 = arith.cmpi eq, %2, %16 : vector<8x128xi32>
    %18 = arith.extui %17 : vector<8x128xi1> to vector<8x128xi32>
    %19 = arith.sitofp %18 : vector<8x128xi32> to vector<8x128xf32>
    %cst_4 = arith.constant dense<0.000000e+00> : vector<8x384xf32>
    %20 = tpu.matmul %19, %1, %cst_4 {dimension_numbers = #tpu.dot_dimension_numbers<[1], [0], [0], [1], [0, 0, 1, 1], [], []>} : vector<8x128xf32>, vector<128x384xf32>, vector<8x384xf32> -> vector<8x384xf32>
    %21 = vector.extract_strided_slice %8 {offsets = [0, 0], sizes = [8, 128], strides = [1, 1]} : vector<8x384xf32> to vector<8x128xf32>
    %22 = vector.extract_strided_slice %14 {offsets = [0, 128], sizes = [8, 128], strides = [1, 1]} : vector<8x384xf32> to vector<8x128xf32>
    %23 = arith.addf %21, %22 : vector<8x128xf32>
    %24 = vector.extract_strided_slice %20 {offsets = [0, 256], sizes = [8, 128], strides = [1, 1]} : vector<8x384xf32> to vector<8x128xf32>
    %25 = arith.addf %23, %24 : vector<8x128xf32>
    %26 = vector.extract_strided_slice %0 {offsets = [0, 3], sizes = [8, 1], strides = [1, 1]} : vector<8x16xi32> to vector<8x1xi32>
    %27 = vector.broadcast %26 : vector<8x1xi32> to vector<8x128xi32>
    %28 = arith.cmpi eq, %2, %27 : vector<8x128xi32>
    %29 = arith.extui %28 : vector<8x128xi1> to vector<8x128xi32>
    %30 = arith.sitofp %29 : vector<8x128xi32> to vector<8x128xf32>
    %cst_5 = arith.constant dense<0.000000e+00> : vector<8x384xf32>
    %31 = tpu.matmul %30, %1, %cst_5 {dimension_numbers = #tpu.dot_dimension_numbers<[1], [0], [0], [1], [0, 0, 1, 1], [], []>} : vector<8x128xf32>, vector<128x384xf32>, vector<8x384xf32> -> vector<8x384xf32>
    %32 = vector.extract_strided_slice %14 {offsets = [0, 0], sizes = [8, 128], strides = [1, 1]} : vector<8x384xf32> to vector<8x128xf32>
    %33 = vector.extract_strided_slice %20 {offsets = [0, 128], sizes = [8, 128], strides = [1, 1]} : vector<8x384xf32> to vector<8x128xf32>
    %34 = arith.addf %32, %33 : vector<8x128xf32>
    %35 = vector.extract_strided_slice %31 {offsets = [0, 256], sizes = [8, 128], strides = [1, 1]} : vector<8x384xf32> to vector<8x128xf32>
    %36 = arith.addf %34, %35 : vector<8x128xf32>
    %37 = arith.maximumf %25, %36 : vector<8x128xf32>
    %38 = vector.extract_strided_slice %0 {offsets = [0, 4], sizes = [8, 1], strides = [1, 1]} : vector<8x16xi32> to vector<8x1xi32>
    %39 = vector.broadcast %38 : vector<8x1xi32> to vector<8x128xi32>
    %40 = arith.cmpi eq, %2, %39 : vector<8x128xi32>
    %41 = arith.extui %40 : vector<8x128xi1> to vector<8x128xi32>
    %42 = arith.sitofp %41 : vector<8x128xi32> to vector<8x128xf32>
    %cst_6 = arith.constant dense<0.000000e+00> : vector<8x384xf32>
    %43 = tpu.matmul %42, %1, %cst_6 {dimension_numbers = #tpu.dot_dimension_numbers<[1], [0], [0], [1], [0, 0, 1, 1], [], []>} : vector<8x128xf32>, vector<128x384xf32>, vector<8x384xf32> -> vector<8x384xf32>
    %44 = vector.extract_strided_slice %20 {offsets = [0, 0], sizes = [8, 128], strides = [1, 1]} : vector<8x384xf32> to vector<8x128xf32>
    %45 = vector.extract_strided_slice %31 {offsets = [0, 128], sizes = [8, 128], strides = [1, 1]} : vector<8x384xf32> to vector<8x128xf32>
    %46 = arith.addf %44, %45 : vector<8x128xf32>
    %47 = vector.extract_strided_slice %43 {offsets = [0, 256], sizes = [8, 128], strides = [1, 1]} : vector<8x384xf32> to vector<8x128xf32>
    %48 = arith.addf %46, %47 : vector<8x128xf32>
    %49 = arith.maximumf %37, %48 : vector<8x128xf32>
    %50 = vector.extract_strided_slice %0 {offsets = [0, 5], sizes = [8, 1], strides = [1, 1]} : vector<8x16xi32> to vector<8x1xi32>
    %51 = vector.broadcast %50 : vector<8x1xi32> to vector<8x128xi32>
    %52 = arith.cmpi eq, %2, %51 : vector<8x128xi32>
    %53 = arith.extui %52 : vector<8x128xi1> to vector<8x128xi32>
    %54 = arith.sitofp %53 : vector<8x128xi32> to vector<8x128xf32>
    %cst_7 = arith.constant dense<0.000000e+00> : vector<8x384xf32>
    %55 = tpu.matmul %54, %1, %cst_7 {dimension_numbers = #tpu.dot_dimension_numbers<[1], [0], [0], [1], [0, 0, 1, 1], [], []>} : vector<8x128xf32>, vector<128x384xf32>, vector<8x384xf32> -> vector<8x384xf32>
    %56 = vector.extract_strided_slice %31 {offsets = [0, 0], sizes = [8, 128], strides = [1, 1]} : vector<8x384xf32> to vector<8x128xf32>
    %57 = vector.extract_strided_slice %43 {offsets = [0, 128], sizes = [8, 128], strides = [1, 1]} : vector<8x384xf32> to vector<8x128xf32>
    %58 = arith.addf %56, %57 : vector<8x128xf32>
    %59 = vector.extract_strided_slice %55 {offsets = [0, 256], sizes = [8, 128], strides = [1, 1]} : vector<8x384xf32> to vector<8x128xf32>
    %60 = arith.addf %58, %59 : vector<8x128xf32>
    %61 = arith.maximumf %49, %60 : vector<8x128xf32>
    %62 = vector.extract_strided_slice %0 {offsets = [0, 6], sizes = [8, 1], strides = [1, 1]} : vector<8x16xi32> to vector<8x1xi32>
    %63 = vector.broadcast %62 : vector<8x1xi32> to vector<8x128xi32>
    %64 = arith.cmpi eq, %2, %63 : vector<8x128xi32>
    %65 = arith.extui %64 : vector<8x128xi1> to vector<8x128xi32>
    %66 = arith.sitofp %65 : vector<8x128xi32> to vector<8x128xf32>
    %cst_8 = arith.constant dense<0.000000e+00> : vector<8x384xf32>
    %67 = tpu.matmul %66, %1, %cst_8 {dimension_numbers = #tpu.dot_dimension_numbers<[1], [0], [0], [1], [0, 0, 1, 1], [], []>} : vector<8x128xf32>, vector<128x384xf32>, vector<8x384xf32> -> vector<8x384xf32>
    %68 = vector.extract_strided_slice %43 {offsets = [0, 0], sizes = [8, 128], strides = [1, 1]} : vector<8x384xf32> to vector<8x128xf32>
    %69 = vector.extract_strided_slice %55 {offsets = [0, 128], sizes = [8, 128], strides = [1, 1]} : vector<8x384xf32> to vector<8x128xf32>
    %70 = arith.addf %68, %69 : vector<8x128xf32>
    %71 = vector.extract_strided_slice %67 {offsets = [0, 256], sizes = [8, 128], strides = [1, 1]} : vector<8x384xf32> to vector<8x128xf32>
    %72 = arith.addf %70, %71 : vector<8x128xf32>
    %73 = arith.maximumf %61, %72 : vector<8x128xf32>
    %74 = vector.extract_strided_slice %0 {offsets = [0, 7], sizes = [8, 1], strides = [1, 1]} : vector<8x16xi32> to vector<8x1xi32>
    %75 = vector.broadcast %74 : vector<8x1xi32> to vector<8x128xi32>
    %76 = arith.cmpi eq, %2, %75 : vector<8x128xi32>
    %77 = arith.extui %76 : vector<8x128xi1> to vector<8x128xi32>
    %78 = arith.sitofp %77 : vector<8x128xi32> to vector<8x128xf32>
    %cst_9 = arith.constant dense<0.000000e+00> : vector<8x384xf32>
    %79 = tpu.matmul %78, %1, %cst_9 {dimension_numbers = #tpu.dot_dimension_numbers<[1], [0], [0], [1], [0, 0, 1, 1], [], []>} : vector<8x128xf32>, vector<128x384xf32>, vector<8x384xf32> -> vector<8x384xf32>
    %80 = vector.extract_strided_slice %55 {offsets = [0, 0], sizes = [8, 128], strides = [1, 1]} : vector<8x384xf32> to vector<8x128xf32>
    %81 = vector.extract_strided_slice %67 {offsets = [0, 128], sizes = [8, 128], strides = [1, 1]} : vector<8x384xf32> to vector<8x128xf32>
    %82 = arith.addf %80, %81 : vector<8x128xf32>
    %83 = vector.extract_strided_slice %79 {offsets = [0, 256], sizes = [8, 128], strides = [1, 1]} : vector<8x384xf32> to vector<8x128xf32>
    %84 = arith.addf %82, %83 : vector<8x128xf32>
    %85 = arith.maximumf %73, %84 : vector<8x128xf32>
    %86 = vector.extract_strided_slice %0 {offsets = [0, 8], sizes = [8, 1], strides = [1, 1]} : vector<8x16xi32> to vector<8x1xi32>
    %87 = vector.broadcast %86 : vector<8x1xi32> to vector<8x128xi32>
    %88 = arith.cmpi eq, %2, %87 : vector<8x128xi32>
    %89 = arith.extui %88 : vector<8x128xi1> to vector<8x128xi32>
    %90 = arith.sitofp %89 : vector<8x128xi32> to vector<8x128xf32>
    %cst_10 = arith.constant dense<0.000000e+00> : vector<8x384xf32>
    %91 = tpu.matmul %90, %1, %cst_10 {dimension_numbers = #tpu.dot_dimension_numbers<[1], [0], [0], [1], [0, 0, 1, 1], [], []>} : vector<8x128xf32>, vector<128x384xf32>, vector<8x384xf32> -> vector<8x384xf32>
    %92 = vector.extract_strided_slice %67 {offsets = [0, 0], sizes = [8, 128], strides = [1, 1]} : vector<8x384xf32> to vector<8x128xf32>
    %93 = vector.extract_strided_slice %79 {offsets = [0, 128], sizes = [8, 128], strides = [1, 1]} : vector<8x384xf32> to vector<8x128xf32>
    %94 = arith.addf %92, %93 : vector<8x128xf32>
    %95 = vector.extract_strided_slice %91 {offsets = [0, 256], sizes = [8, 128], strides = [1, 1]} : vector<8x384xf32> to vector<8x128xf32>
    %96 = arith.addf %94, %95 : vector<8x128xf32>
    %97 = arith.maximumf %85, %96 : vector<8x128xf32>
    %98 = vector.extract_strided_slice %0 {offsets = [0, 9], sizes = [8, 1], strides = [1, 1]} : vector<8x16xi32> to vector<8x1xi32>
    %99 = vector.broadcast %98 : vector<8x1xi32> to vector<8x128xi32>
    %100 = arith.cmpi eq, %2, %99 : vector<8x128xi32>
    %101 = arith.extui %100 : vector<8x128xi1> to vector<8x128xi32>
    %102 = arith.sitofp %101 : vector<8x128xi32> to vector<8x128xf32>
    %cst_11 = arith.constant dense<0.000000e+00> : vector<8x384xf32>
    %103 = tpu.matmul %102, %1, %cst_11 {dimension_numbers = #tpu.dot_dimension_numbers<[1], [0], [0], [1], [0, 0, 1, 1], [], []>} : vector<8x128xf32>, vector<128x384xf32>, vector<8x384xf32> -> vector<8x384xf32>
    %104 = vector.extract_strided_slice %79 {offsets = [0, 0], sizes = [8, 128], strides = [1, 1]} : vector<8x384xf32> to vector<8x128xf32>
    %105 = vector.extract_strided_slice %91 {offsets = [0, 128], sizes = [8, 128], strides = [1, 1]} : vector<8x384xf32> to vector<8x128xf32>
    %106 = arith.addf %104, %105 : vector<8x128xf32>
    %107 = vector.extract_strided_slice %103 {offsets = [0, 256], sizes = [8, 128], strides = [1, 1]} : vector<8x384xf32> to vector<8x128xf32>
    %108 = arith.addf %106, %107 : vector<8x128xf32>
    %109 = arith.maximumf %97, %108 : vector<8x128xf32>
    %110 = vector.extract_strided_slice %0 {offsets = [0, 10], sizes = [8, 1], strides = [1, 1]} : vector<8x16xi32> to vector<8x1xi32>
    %111 = vector.broadcast %110 : vector<8x1xi32> to vector<8x128xi32>
    %112 = arith.cmpi eq, %2, %111 : vector<8x128xi32>
    %113 = arith.extui %112 : vector<8x128xi1> to vector<8x128xi32>
    %114 = arith.sitofp %113 : vector<8x128xi32> to vector<8x128xf32>
    %cst_12 = arith.constant dense<0.000000e+00> : vector<8x384xf32>
    %115 = tpu.matmul %114, %1, %cst_12 {dimension_numbers = #tpu.dot_dimension_numbers<[1], [0], [0], [1], [0, 0, 1, 1], [], []>} : vector<8x128xf32>, vector<128x384xf32>, vector<8x384xf32> -> vector<8x384xf32>
    %116 = vector.extract_strided_slice %91 {offsets = [0, 0], sizes = [8, 128], strides = [1, 1]} : vector<8x384xf32> to vector<8x128xf32>
    %117 = vector.extract_strided_slice %103 {offsets = [0, 128], sizes = [8, 128], strides = [1, 1]} : vector<8x384xf32> to vector<8x128xf32>
    %118 = arith.addf %116, %117 : vector<8x128xf32>
    %119 = vector.extract_strided_slice %115 {offsets = [0, 256], sizes = [8, 128], strides = [1, 1]} : vector<8x384xf32> to vector<8x128xf32>
    %120 = arith.addf %118, %119 : vector<8x128xf32>
    %121 = arith.maximumf %109, %120 : vector<8x128xf32>
    %122 = vector.extract_strided_slice %0 {offsets = [0, 11], sizes = [8, 1], strides = [1, 1]} : vector<8x16xi32> to vector<8x1xi32>
    %123 = vector.broadcast %122 : vector<8x1xi32> to vector<8x128xi32>
    %124 = arith.cmpi eq, %2, %123 : vector<8x128xi32>
    %125 = arith.extui %124 : vector<8x128xi1> to vector<8x128xi32>
    %126 = arith.sitofp %125 : vector<8x128xi32> to vector<8x128xf32>
    %cst_13 = arith.constant dense<0.000000e+00> : vector<8x384xf32>
    %127 = tpu.matmul %126, %1, %cst_13 {dimension_numbers = #tpu.dot_dimension_numbers<[1], [0], [0], [1], [0, 0, 1, 1], [], []>} : vector<8x128xf32>, vector<128x384xf32>, vector<8x384xf32> -> vector<8x384xf32>
    %128 = vector.extract_strided_slice %103 {offsets = [0, 0], sizes = [8, 128], strides = [1, 1]} : vector<8x384xf32> to vector<8x128xf32>
    %129 = vector.extract_strided_slice %115 {offsets = [0, 128], sizes = [8, 128], strides = [1, 1]} : vector<8x384xf32> to vector<8x128xf32>
    %130 = arith.addf %128, %129 : vector<8x128xf32>
    %131 = vector.extract_strided_slice %127 {offsets = [0, 256], sizes = [8, 128], strides = [1, 1]} : vector<8x384xf32> to vector<8x128xf32>
    %132 = arith.addf %130, %131 : vector<8x128xf32>
    %133 = arith.maximumf %121, %132 : vector<8x128xf32>
    %134 = vector.extract_strided_slice %0 {offsets = [0, 12], sizes = [8, 1], strides = [1, 1]} : vector<8x16xi32> to vector<8x1xi32>
    %135 = vector.broadcast %134 : vector<8x1xi32> to vector<8x128xi32>
    %136 = arith.cmpi eq, %2, %135 : vector<8x128xi32>
    %137 = arith.extui %136 : vector<8x128xi1> to vector<8x128xi32>
    %138 = arith.sitofp %137 : vector<8x128xi32> to vector<8x128xf32>
    %cst_14 = arith.constant dense<0.000000e+00> : vector<8x384xf32>
    %139 = tpu.matmul %138, %1, %cst_14 {dimension_numbers = #tpu.dot_dimension_numbers<[1], [0], [0], [1], [0, 0, 1, 1], [], []>} : vector<8x128xf32>, vector<128x384xf32>, vector<8x384xf32> -> vector<8x384xf32>
    %140 = vector.extract_strided_slice %115 {offsets = [0, 0], sizes = [8, 128], strides = [1, 1]} : vector<8x384xf32> to vector<8x128xf32>
    %141 = vector.extract_strided_slice %127 {offsets = [0, 128], sizes = [8, 128], strides = [1, 1]} : vector<8x384xf32> to vector<8x128xf32>
    %142 = arith.addf %140, %141 : vector<8x128xf32>
    %143 = vector.extract_strided_slice %139 {offsets = [0, 256], sizes = [8, 128], strides = [1, 1]} : vector<8x384xf32> to vector<8x128xf32>
    %144 = arith.addf %142, %143 : vector<8x128xf32>
    %145 = arith.maximumf %133, %144 : vector<8x128xf32>
    %146 = vector.extract_strided_slice %0 {offsets = [0, 13], sizes = [8, 1], strides = [1, 1]} : vector<8x16xi32> to vector<8x1xi32>
    %147 = vector.broadcast %146 : vector<8x1xi32> to vector<8x128xi32>
    %148 = arith.cmpi eq, %2, %147 : vector<8x128xi32>
    %149 = arith.extui %148 : vector<8x128xi1> to vector<8x128xi32>
    %150 = arith.sitofp %149 : vector<8x128xi32> to vector<8x128xf32>
    %cst_15 = arith.constant dense<0.000000e+00> : vector<8x384xf32>
    %151 = tpu.matmul %150, %1, %cst_15 {dimension_numbers = #tpu.dot_dimension_numbers<[1], [0], [0], [1], [0, 0, 1, 1], [], []>} : vector<8x128xf32>, vector<128x384xf32>, vector<8x384xf32> -> vector<8x384xf32>
    %152 = vector.extract_strided_slice %127 {offsets = [0, 0], sizes = [8, 128], strides = [1, 1]} : vector<8x384xf32> to vector<8x128xf32>
    %153 = vector.extract_strided_slice %139 {offsets = [0, 128], sizes = [8, 128], strides = [1, 1]} : vector<8x384xf32> to vector<8x128xf32>
    %154 = arith.addf %152, %153 : vector<8x128xf32>
    %155 = vector.extract_strided_slice %151 {offsets = [0, 256], sizes = [8, 128], strides = [1, 1]} : vector<8x384xf32> to vector<8x128xf32>
    %156 = arith.addf %154, %155 : vector<8x128xf32>
    %157 = arith.maximumf %145, %156 : vector<8x128xf32>
    %158 = vector.extract_strided_slice %0 {offsets = [0, 14], sizes = [8, 1], strides = [1, 1]} : vector<8x16xi32> to vector<8x1xi32>
    %159 = vector.broadcast %158 : vector<8x1xi32> to vector<8x128xi32>
    %160 = arith.cmpi eq, %2, %159 : vector<8x128xi32>
    %161 = arith.extui %160 : vector<8x128xi1> to vector<8x128xi32>
    %162 = arith.sitofp %161 : vector<8x128xi32> to vector<8x128xf32>
    %cst_16 = arith.constant dense<0.000000e+00> : vector<8x384xf32>
    %163 = tpu.matmul %162, %1, %cst_16 {dimension_numbers = #tpu.dot_dimension_numbers<[1], [0], [0], [1], [0, 0, 1, 1], [], []>} : vector<8x128xf32>, vector<128x384xf32>, vector<8x384xf32> -> vector<8x384xf32>
    %164 = vector.extract_strided_slice %139 {offsets = [0, 0], sizes = [8, 128], strides = [1, 1]} : vector<8x384xf32> to vector<8x128xf32>
    %165 = vector.extract_strided_slice %151 {offsets = [0, 128], sizes = [8, 128], strides = [1, 1]} : vector<8x384xf32> to vector<8x128xf32>
    %166 = arith.addf %164, %165 : vector<8x128xf32>
    %167 = vector.extract_strided_slice %163 {offsets = [0, 256], sizes = [8, 128], strides = [1, 1]} : vector<8x384xf32> to vector<8x128xf32>
    %168 = arith.addf %166, %167 : vector<8x128xf32>
    %169 = arith.maximumf %157, %168 : vector<8x128xf32>
    %170 = vector.extract_strided_slice %0 {offsets = [0, 15], sizes = [8, 1], strides = [1, 1]} : vector<8x16xi32> to vector<8x1xi32>
    %171 = vector.broadcast %170 : vector<8x1xi32> to vector<8x128xi32>
    %172 = arith.cmpi eq, %2, %171 : vector<8x128xi32>
    %173 = arith.extui %172 : vector<8x128xi1> to vector<8x128xi32>
    %174 = arith.sitofp %173 : vector<8x128xi32> to vector<8x128xf32>
    %cst_17 = arith.constant dense<0.000000e+00> : vector<8x384xf32>
    %175 = tpu.matmul %174, %1, %cst_17 {dimension_numbers = #tpu.dot_dimension_numbers<[1], [0], [0], [1], [0, 0, 1, 1], [], []>} : vector<8x128xf32>, vector<128x384xf32>, vector<8x384xf32> -> vector<8x384xf32>
    %176 = vector.extract_strided_slice %151 {offsets = [0, 0], sizes = [8, 128], strides = [1, 1]} : vector<8x384xf32> to vector<8x128xf32>
    %177 = vector.extract_strided_slice %163 {offsets = [0, 128], sizes = [8, 128], strides = [1, 1]} : vector<8x384xf32> to vector<8x128xf32>
    %178 = arith.addf %176, %177 : vector<8x128xf32>
    %179 = vector.extract_strided_slice %175 {offsets = [0, 256], sizes = [8, 128], strides = [1, 1]} : vector<8x384xf32> to vector<8x128xf32>
    %180 = arith.addf %178, %179 : vector<8x128xf32>
    %181 = arith.maximumf %169, %180 : vector<8x128xf32>
    %c0_18 = arith.constant 0 : index
    %c0_19 = arith.constant 0 : index
    %182 = vector.load %arg3[%c0_18, %c0_19] : memref<1x128xf32, #tpu.memory_space<vmem>>, vector<1x128xf32>
    %183 = vector.broadcast %182 : vector<1x128xf32> to vector<8x128xf32>
    %184 = arith.addf %181, %183 : vector<8x128xf32>
    %cst_20 = arith.constant 0.000000e+00 : f32
    %185 = vector.broadcast %cst_20 : f32 to vector<8x128xf32>
    %186 = arith.maximumf %184, %185 : vector<8x128xf32>
    %c0_21 = arith.constant 0 : index
    %c0_22 = arith.constant 0 : index
    %187 = vector.load %arg4[%c0_21, %c0_22] : memref<128x128xf32, #tpu.memory_space<vmem>>, vector<128x128xf32>
    %cst_23 = arith.constant dense<0.000000e+00> : vector<8x128xf32>
    %188 = tpu.matmul %186, %187, %cst_23 {dimension_numbers = #tpu.dot_dimension_numbers<[1], [0], [0], [1], [0, 0, 1, 1], [], []>} : vector<8x128xf32>, vector<128x128xf32>, vector<8x128xf32> -> vector<8x128xf32>
    %c0_24 = arith.constant 0 : index
    %c0_25 = arith.constant 0 : index
    %189 = vector.load %arg5[%c0_24, %c0_25] : memref<1x128xf32, #tpu.memory_space<vmem>>, vector<1x128xf32>
    %190 = vector.broadcast %189 : vector<1x128xf32> to vector<8x128xf32>
    %191 = arith.addf %188, %190 : vector<8x128xf32>
    %c0_26 = arith.constant 0 : index
    %c0_27 = arith.constant 0 : index
    %192 = vector.load %arg6[%c0_26, %c0_27] : memref<8x128xf32, #tpu.memory_space<vmem>>, vector<8x128xf32>
    tpu.vector_store %arg6[%c0_26, %c0_27], %191 {strides = array<i32>} : memref<8x128xf32, #tpu.memory_space<vmem>>, vector<8x128xf32>,
    return
  }
  func.func @transform_0(%arg0: i32) -> (i32, i32) {
    %c0_i32 = arith.constant 0 : i32
    %c0_i32_0 = arith.constant 0 : i32
    return %arg0, %c0_i32 : i32, i32
  }
  func.func @transform_1(%arg0: i32) -> (i32, i32) {
    %c0_i32 = arith.constant 0 : i32
    %c0_i32_0 = arith.constant 0 : i32
    %c0_i32_1 = arith.constant 0 : i32
    return %c0_i32, %c0_i32_0 : i32, i32
  }
  func.func @transform_2(%arg0: i32) -> (i32, i32) {
    %c0_i32 = arith.constant 0 : i32
    %c0_i32_0 = arith.constant 0 : i32
    %c0_i32_1 = arith.constant 0 : i32
    return %c0_i32, %c0_i32_0 : i32, i32
  }
  func.func @transform_3(%arg0: i32) -> (i32, i32) {
    %c0_i32 = arith.constant 0 : i32
    %c0_i32_0 = arith.constant 0 : i32
    %c0_i32_1 = arith.constant 0 : i32
    return %c0_i32, %c0_i32_0 : i32, i32
  }
  func.func @transform_4(%arg0: i32) -> (i32, i32) {
    %c0_i32 = arith.constant 0 : i32
    %c0_i32_0 = arith.constant 0 : i32
    %c0_i32_1 = arith.constant 0 : i32
    return %c0_i32, %c0_i32_0 : i32, i32
  }
  func.func @transform_5(%arg0: i32) -> (i32, i32) {
    %c0_i32 = arith.constant 0 : i32
    %c0_i32_0 = arith.constant 0 : i32
    return %arg0, %c0_i32 : i32, i32
  }
}

</mosaic_0001>

<bundles_post_ra>
// kernel: tpu_custom_call.1
= control target key start
LH: loop header
LB: loop body
LE: loop exit
PB: predicated region body
PF: predicated region fallthrough
CT: control target
= control target key end

     0   :  { %10 = vsyncpa [#allocation3], 0  ;;  %s4847_s0 = inlined_call_operand.hbm [shape: s32[8,16], index: 0, kind: input, shape index: {}]   ;;  %s4848_s1 = inlined_call_operand.hbm [shape: f32[128,384], index: 1, kind: input, shape index: {}]   ;;  %s4849_s2 = inlined_call_operand.vmem [shape: f32[1,128], index: 2, kind: input, shape index: {}]   ;;  %s4850_s3 = inlined_call_operand.hbm [shape: f32[128,128], index: 3, kind: input, shape index: {}]   ;;  %s4851_s4 = inlined_call_operand.vmem [shape: f32[1,128], index: 4, kind: input, shape index: {}]   ;;  %s4852_s5 = inlined_call_operand.hbm [shape: f32[8,128], index: 5, kind: output, shape index: {}]  }
   0x1   :  { %11 = vsyncpa [#allocation6], 0 }
   0x2   :  { %12 = vsyncpa [#allocation4], 0  ;;  %s3416_s18 = smov [#allocation5]  }
   0x3   :  { %s28_s19 = sshll.u32 %s3416_s18, 4  ;;  %s29_s19 = int_to_ptr.vmem [resolvable:$true] %s28_s19 }
   0x4   :  { %s3338_s20 = scalar_lea.vmem %s29_s19, 6144  ;;  %p3343_p1 = scmp.lt.s32.totalorder %s29_s19, %s29_s19 }
   0x5   :  { %p3339_p0 = scmp.ne.s32.totalorder %s29_s19, %s3338_s20  ;;  %p3344_p2 = scmp.lt.s32.totalorder %s3338_s20, %s3338_s20 }
   0x7   :  { %p3345_p3 = por %p3344_p2, %p3343_p1 }
   0x9   :  { %p3346_p4 = pnand %p3345_p3, %p3339_p0 }
   0xb   :  { %3349 = shalt.err (!%p3346_p4)
}
   0xc   :  { %s3417_s21 = smov 384   ;;  %s3418_s22 = smov 24  }
   0xd   :  { %34 = dma.hbm_to_vmem [thread:$0]  %s4848_s1, 6144, %s29_s19, [#allocation6], %s3417_s21, %s3417_s21, %s3418_s22  }
   0xe   :  { %s3419_s25 = smov [#allocation2]   ;;  %s3420_s27 = smov [#allocation7]  }
   0xf   :  { %s19_s26 = sshll.u32 %s3419_s25, 4  ;;  %s42_s28 = sshll.u32 %s3420_s27, 4  ;;  %s20_s26 = int_to_ptr.vmem [resolvable:$true] %s19_s26  ;;  %s43_s28 = int_to_ptr.vmem [resolvable:$true] %s42_s28 }
  0x10   :  { %s3358_s29 = scalar_lea.vmem %s20_s26, 128  ;;  %p3363_p6 = scmp.lt.s32.totalorder %s20_s26, %s20_s26 }
  0x11   :  { %p3359_p5 = scmp.ne.s32.totalorder %s20_s26, %s3358_s29  ;;  %p3364_p7 = scmp.lt.s32.totalorder %s3358_s29, %s3358_s29 }
  0x13   :  { %p3365_p8 = por %p3364_p7, %p3363_p6 }
  0x15   :  { %p3366_p9 = pnand %p3365_p8, %p3359_p5 }
  0x17   :  { %3369 = shalt.err (!%p3366_p9)
}
  0x18   :  { %22 = dma.hbm_to_vmem [thread:$0]  %s4847_s0, 128, %s20_s26, [#allocation3]  }
  0x19   :  { %s3378_s7 = scalar_lea.vmem %s43_s28, 2048  ;;  %p3383_p11 = scmp.lt.s32.totalorder %s43_s28, %s43_s28 }
  0x1a   :  { %p3379_p10 = scmp.ne.s32.totalorder %s43_s28, %s3378_s7  ;;  %p3384_p12 = scmp.lt.s32.totalorder %s3378_s7, %s3378_s7 }
  0x1c   :  { %p3385_p13 = por %p3384_p12, %p3383_p11 }
  0x1e   :  { %p3386_p0 = pnand %p3385_p13, %p3379_p10 }
  0x20   :  { %3389 = shalt.err (!%p3386_p0)
}
  0x21   :  { %s3421_s1 = smov 128   ;;  %s3422_s8 = smov 8  }
  0x22   :  { %48 = dma.hbm_to_vmem [thread:$0]  %s4850_s3, 2048, %s43_s28, [#allocation6], %s3421_s1, %s3421_s1, %s3422_s8  }
  0x23   :  { %3410 = dma.done.wait [#allocation3], 128  }
  0x24   :  { %3411 = vsyncadd [#allocation3], 4294967168 }
  0x25   :  { %3412 = dma.done.wait [#allocation6], 8192  }
  0x26   :  { %3413 = vsyncadd [#allocation6], 4294959104  ;;  %v3423_v0 = vmov 0   ;;  %v3424_v1 = vmov 2   ;;  %v3425_v2 = vmov 0.0   ;;  %v3484_v3 = vld [vmem:[#allocation2] sm:$0xff]  ;;  %v109_v43 = vlaneseq }
  0x27   :  { %3264 = vset.pattern.permute.xlu0 %v3423_v0  ;;  %3266 = vset.pattern.permute.xlu1 %v3424_v1  ;;  %v3486_v4 = vld [vmem:[#allocation5 + $0x170] sm:$0xff]  ;;  %v3488_v5 = vld [vmem:[#allocation5 + $0x168] sm:$0xff]  ;;  %v3492_v6 = vld [vmem:[#allocation5 + $0x158] sm:$0xff]  ;;  %v3426_v8 = vmov 1   ;;  %v3427_v9 = vmov 3   ;;  %v3428_v15 = vmov 4  }
  0x28   :  { %181 = vmatprep.mubr.f32.mxu0 %v3425_v2  ;;  %257 = vmatprep.mubr.f32.mxu1 %v3425_v2  ;;  %v3499_v7 = vld [vmem:[#allocation5 + $0x150] sm:$0xff]  ;;  %v3502_v10 = vld [vmem:[#allocation5 + $0x140] sm:$0xff]  ;;  %v3506_v11 = vld [vmem:[#allocation5 + $0x138] sm:$0xff]  ;;  %v3429_v39 = vmov 5   ;;  %v3430_v40 = vmov 6   ;;  %v3431_v41 = vmov 7  }
  0x29   :  { %112 = vperm.xlu0 %3264, %v3484_v3   ;;  %265 = vperm.xlu1 %3266, %v3484_v3   ;;  %v3509_v12 = vld [vmem:[#allocation5 + $0x128] sm:$0xff]  ;;  %v3513_v13 = vld [vmem:[#allocation5 + $0x120] sm:$0xff]  ;;  %v3517_v14 = vld [vmem:[#allocation5 + $0x110] sm:$0xff]  ;;  %v3432_v42 = vmov 8   ;;  %v3625_v44 = vand.u32 127, %v109_v43  ;;  %v3433_v46 = vmov 1.0  }
  0x2a   :  { %117 = vmatprep.subr.mxu0 %v3486_v4  ;;  %193 = vmatprep.subr.mxu1 %v3486_v4  ;;  %v3521_v16 = vld [vmem:[#allocation5 + $0x108] sm:$0xff]  ;;  %v3525_v17 = vld [vmem:[#allocation5 + $0xf8] sm:$0xff]  ;;  %v3528_v18 = vld [vmem:[#allocation5 + $0xf0] sm:$0xff]  ;;  %vm3434_vm3 = vmmov 0   ;;  %s3442_s13 = smov [#allocation8]  }
  0x2b   :  { %118 = vmatpush1.msra.mxu0 %v3488_v5  ;;  %194 = vmatpush1.msra.mxu1 %v3488_v5  ;;  %v3532_v19 = vld [vmem:[#allocation5 + $0xe0] sm:$0xff]  ;;  %v3536_v20 = vld [vmem:[#allocation5 + $0xd8] sm:$0xff]  ;;  %v3540_v21 = vld [vmem:[#allocation5 + $0xc8] sm:$0xff]  ;;  %s2400_s14 = sshll.u32 %s3442_s13, 4  ;;  %s2401_s14 = int_to_ptr.vmem [resolvable:$true] %s2400_s14 }
  0x2c   :  { %119 = vmatprep.subr.mxu0 %v3492_v6  ;;  %195 = vmatprep.subr.mxu1 %v3492_v6  ;;  %v3544_v22 = vld [vmem:[#allocation5 + $0xc0] sm:$0xff]  ;;  %v3548_v23 = vld [vmem:[#allocation5 + $0xb0] sm:$0xff]  ;;  %v3552_v24 = vld [vmem:[#allocation5 + $0xa8] sm:$0xff]  ;;  %s3390_s15 = scalar_lea.vmem %s2401_s14, 128  ;;  %p3395_p2 = scmp.lt.s32.totalorder %s2401_s14, %s2401_s14 }
  0x2d   :  { %3265 = vset.pattern.permute.xlu0 %v3426_v8  ;;  %3267 = vset.pattern.permute.xlu1 %v3427_v9  ;;  %v3556_v25 = vld [vmem:[#allocation5 + $0x98] sm:$0xff]  ;;  %v3560_v26 = vld [vmem:[#allocation5 + $0x90] sm:$0xff]  ;;  %v3564_v27 = vld [vmem:[#allocation5 + $0x80] sm:$0xff]  ;;  %p3391_p1 = scmp.ne.s32.totalorder %s2401_s14, %s3390_s15  ;;  %p3396_p3 = scmp.lt.s32.totalorder %s3390_s15, %s3390_s15 }
  0x2e   :  { %188 = vperm.xlu0 %3265, %v3484_v3   ;;  %414 = vperm.xlu1 %3267, %v3484_v3   ;;  %v3568_v28 = vld [vmem:[#allocation5 + $0x78] sm:$0xff]  ;;  %v3572_v29 = vld [vmem:[#allocation5 + $0x68] sm:$0xff]  ;;  %v3576_v30 = vld [vmem:[#allocation5 + $0x60] sm:$0xff] }
  0x2f   :  { %120 = vmatpush1.msra.mxu0 %v3499_v7  ;;  %196 = vmatpush1.msra.mxu1 %v3499_v7  ;;  %v3580_v31 = vld [vmem:[#allocation5 + $0x50] sm:$0xff]  ;;  %v3584_v32 = vld [vmem:[#allocation5 + $0x48] sm:$0xff]  ;;  %v3588_v33 = vld [vmem:[#allocation5 + $0x38] sm:$0xff]  ;;  %p3397_p4 = por %p3396_p3, %p3395_p2 }
  0x30   :  { %121 = vmatprep.subr.mxu0 %v3502_v10  ;;  %197 = vmatprep.subr.mxu1 %v3502_v10  ;;  %v3592_v34 = vld [vmem:[#allocation5 + $0x30] sm:$0xff]  ;;  %v3596_v35 = vld [vmem:[#allocation5 + $0x20] sm:$0xff]  ;;  %v3600_v36 = vld [vmem:[#allocation5 + $0x18] sm:$0xff] }
  0x31   :  { %122 = vmatpush1.msra.mxu0 %v3506_v11  ;;  %198 = vmatpush1.msra.mxu1 %v3506_v11  ;;  %v3604_v37 = vld [vmem:[#allocation5 + $0x8] sm:$0xff]  ;;  %v3608_v38 = vld [vmem:[#allocation5] sm:$0xff]  ;;  %v3633_v48 = vld [vmem:[#allocation5 + $0x178] sm:$0xff]  ;;  %p3398_p5 = pnand %p3397_p4, %p3391_p1 }
  0x32   :  { %3268 = vset.pattern.permute.xlu1 %v3428_v15  ;;  %123 = vmatprep.subr.mxu0 %v3509_v12  ;;  %v3639_v49 = vld [vmem:[#allocation5 + $0x160] sm:$0xff]  ;;  %v3645_v50 = vld [vmem:[#allocation5 + $0x148] sm:$0xff]  ;;  %v3651_v51 = vld [vmem:[#allocation5 + $0x130] sm:$0xff]  ;;  %v3435_v15 = vmov 9  }
  0x33   :  { %564 = vperm.xlu1 %3268, %v3484_v3   ;;  %124 = vmatpush1.msra.mxu0 %v3513_v13  ;;  %v3657_v52 = vld [vmem:[#allocation5 + $0x118] sm:$0xff]  ;;  %v3663_v53 = vld [vmem:[#allocation5 + $0x100] sm:$0xff]  ;;  %v3669_v54 = vld [vmem:[#allocation5 + $0xe8] sm:$0xff] }
  0x34   :  { %125 = vmatprep.subr.mxu0 %v3517_v14  ;;  %199 = vmatprep.subr.mxu1 %v3509_v12  ;;  %v3675_v55 = vld [vmem:[#allocation5 + $0xd0] sm:$0xff]  ;;  %v3681_v56 = vld [vmem:[#allocation5 + $0xb8] sm:$0xff]  ;;  %v3687_v57 = vld [vmem:[#allocation5 + $0xa0] sm:$0xff] }
  0x35   :  { %126 = vmatpush1.msra.mxu0 %v3521_v16  ;;  %200 = vmatpush1.msra.mxu1 %v3513_v13  ;;  %v3693_v58 = vld [vmem:[#allocation5 + $0x88] sm:$0xff]  ;;  %v3699_v59 = vld [vmem:[#allocation5 + $0x70] sm:$0xff]  ;;  %v3705_v61 = vld [vmem:[#allocation5 + $0x58] sm:$0xff] }
  0x36   :  { %127 = vmatprep.subr.mxu0 %v3525_v17  ;;  %201 = vmatprep.subr.mxu1 %v3517_v14  ;;  %v3712_v62 = vld [vmem:[#allocation5 + $0x40] sm:$0xff]  ;;  %v3718_v63 = vld [vmem:[#allocation5 + $0x28] sm:$0xff]  ;;  %v3726_v0 = vld [vmem:[#allocation5 + $0x10] sm:$0xff] }
  0x37   :  { %128 = vmatpush1.msra.mxu0 %v3528_v18  ;;  %202 = vmatpush1.msra.mxu1 %v3521_v16 }
  0x38   :  { %129 = vmatprep.subr.mxu0 %v3532_v19  ;;  %203 = vmatprep.subr.mxu1 %v3525_v17 }
  0x39   :  { %130 = vmatpush1.msra.mxu0 %v3536_v20  ;;  %204 = vmatpush1.msra.mxu1 %v3528_v18 }
  0x3a   :  { %131 = vmatprep.subr.mxu0 %v3540_v21  ;;  %205 = vmatprep.subr.mxu1 %v3532_v19 }
  0x3b   :  { %132 = vmatpush1.msra.mxu0 %v3544_v22  ;;  %206 = vmatpush1.msra.mxu1 %v3536_v20 }
  0x3c   :  { %133 = vmatprep.subr.mxu0 %v3548_v23  ;;  %207 = vmatprep.subr.mxu1 %v3540_v21 }
  0x3d   :  { %134 = vmatpush1.msra.mxu0 %v3552_v24  ;;  %208 = vmatpush1.msra.mxu1 %v3544_v22 }
  0x3e   :  { %135 = vmatprep.subr.mxu0 %v3556_v25  ;;  %209 = vmatprep.subr.mxu1 %v3548_v23 }
  0x3f   :  { %136 = vmatpush1.msra.mxu0 %v3560_v26  ;;  %210 = vmatpush1.msra.mxu1 %v3552_v24 }
  0x40   :  { %137 = vmatprep.subr.mxu0 %v3564_v27  ;;  %211 = vmatprep.subr.mxu1 %v3556_v25 }
  0x41   :  { %138 = vmatpush1.msra.mxu0 %v3568_v28  ;;  %212 = vmatpush1.msra.mxu1 %v3560_v26 }
  0x42   :  { %139 = vmatprep.subr.mxu0 %v3572_v29  ;;  %213 = vmatprep.subr.mxu1 %v3564_v27 }
  0x43   :  { %140 = vmatpush1.msra.mxu0 %v3576_v30  ;;  %214 = vmatpush1.msra.mxu1 %v3568_v28 }
  0x44   :  { %141 = vmatprep.subr.mxu0 %v3580_v31  ;;  %215 = vmatprep.subr.mxu1 %v3572_v29 }
  0x45   :  { %142 = vmatpush1.msra.mxu0 %v3584_v32  ;;  %216 = vmatpush1.msra.mxu1 %v3576_v30 }
  0x46   :  { %143 = vmatprep.subr.mxu0 %v3588_v33  ;;  %217 = vmatprep.subr.mxu1 %v3580_v31 }
  0x47   :  { %144 = vmatpush1.msra.mxu0 %v3592_v34  ;;  %218 = vmatpush1.msra.mxu1 %v3584_v32 }
  0x48   :  { %145 = vmatprep.subr.mxu0 %v3596_v35  ;;  %219 = vmatprep.subr.mxu1 %v3588_v33 }
  0x49   :  { %146 = vmatpush1.msra.mxu0 %v3600_v36  ;;  %220 = vmatpush1.msra.mxu1 %v3592_v34 }
  0x4a   :  { %147 = vmatprep.subr.mxu0 %v3604_v37  ;;  %221 = vmatprep.subr.mxu1 %v3596_v35 }
  0x4b   :  { %148 = vmatpush1.msra.mxu0 %v3608_v38  ;;  %222 = vmatpush1.msra.mxu1 %v3600_v36 }
  0x4c   :  { %270 = vmatprep.subr.mxu0 %v3486_v4  ;;  %3269 = vset.pattern.permute.xlu0 %v3429_v39 }
  0x4d   :  { %223 = vmatprep.subr.mxu1 %v3604_v37  ;;  %714 = vperm.xlu0 %3269, %v3484_v3  }
  0x4e   :  { %224 = vmatpush1.msra.mxu1 %v3608_v38  ;;  %3270 = vset.pattern.permute.xlu1 %v3430_v40  ;;  %v3436_v40 = vmov 10  }
  0x4f   :  { %2712 = vmatprep.subr.mxu1 %v3425_v2  ;;  %864 = vperm.xlu1 %3270, %v3484_v3  }
  0x51   :  { %3272 = vset.pattern.permute.xlu0 %v3432_v42  ;;  %v4209_v42 = vld [vmem:[#allocation5 + $0x48] sm:$0xff] }
  0x52   :  { %1164 = vperm.xlu0 %3272, %v3484_v3  }
  0x53   :  { %3271 = vset.pattern.permute.xlu1 %v3431_v41 }
  0x54   :  { %1014 = vperm.xlu1 %3271, %v3484_v3  }
  0x58   :  { %3273 = vset.pattern.permute.xlu1 %v3435_v15 }
  0x59   :  { %1314 = vperm.xlu1 %3273, %v3484_v3  }
  0x5d   :  { %3274 = vset.pattern.permute.xlu1 %v3436_v40 }
  0x5e   :  { %1464 = vperm.xlu1 %3274, %v3484_v3  }
  0xa4   :  { %v113_v45 = vpop.permute.xlu0 %112  ;;  %v266_v60 = vpop.permute.xlu1 %265 }
  0xa5   :  { %vm114_vm0 = vcmp.eq.s32.totalorder %v3625_v44, %v113_v45  ;;  %vm267_vm2 = vcmp.eq.s32.totalorder %v3625_v44, %v266_v60  ;;  %v4216_v45 = vld [vmem:[#allocation5 + $0x38] sm:$0xff] }
  0xa6   :  { %2411 = vmatmul.mubr.msk.f32.vlgmr.msra.gmra.mxu0 %vm114_vm0, %v3433_v46  ;;  %v4290_v60 = vld [vmem:[#allocation5 + $0x118] sm:$0xff] }
  0xa7   :  { %271 = vmatpush1.msra.mxu0 %v3488_v5  ;;  %334 = vmatprep.mubr.f32.mxu0 %v3425_v2 }
  0xa8   :  { %272 = vmatprep.subr.mxu0 %v3492_v6 }
  0xa9   :  { %273 = vmatpush1.msra.mxu0 %v3499_v7  ;;  %v189_v47 = vpop.permute.xlu0 %188  ;;  %v415_v1 = vpop.permute.xlu1 %414 }
  0xaa   :  { %274 = vmatprep.subr.mxu0 %v3502_v10  ;;  %vm190_vm1 = vcmp.eq.s32.totalorder %v3625_v44, %v189_v47  ;;  %vm416_vm4 = vcmp.eq.s32.totalorder %v3625_v44, %v415_v1 }
  0xab   :  { %275 = vmatpush1.msra.mxu0 %v3506_v11  ;;  %2413 = vmatmul.mubr.msk.f32.vlgmr.msra.gmra.mxu1 %vm190_vm1, %v3433_v46 }
  0xac   :  { %276 = vmatprep.subr.mxu0 %v3509_v12  ;;  %2713 = vmatpush3.msra.mxu1 %v3633_v48 }
  0xad   :  { %277 = vmatpush1.msra.mxu0 %v3513_v13  ;;  %2714 = vmatprep.subr.mxu1 %v3425_v2 }
  0xae   :  { %278 = vmatprep.subr.mxu0 %v3517_v14  ;;  %2715 = vmatpush3.msra.mxu1 %v3639_v49  ;;  %v565_v8 = vpop.permute.xlu1 %564 }
  0xaf   :  { %279 = vmatpush1.msra.mxu0 %v3521_v16  ;;  %2716 = vmatprep.subr.mxu1 %v3425_v2  ;;  %vm566_vm5 = vcmp.eq.s32.totalorder %v3625_v44, %v565_v8  ;;  %v4315_v8 = vld [vmem:[#allocation5 + $0xb8] sm:$0xff] }
  0xb0   :  { %280 = vmatprep.subr.mxu0 %v3525_v17  ;;  %2717 = vmatpush3.msra.mxu1 %v3645_v50 }
  0xb1   :  { %281 = vmatpush1.msra.mxu0 %v3528_v18  ;;  %2718 = vmatprep.subr.mxu1 %v3425_v2 }
  0xb2   :  { %282 = vmatprep.subr.mxu0 %v3532_v19  ;;  %2719 = vmatpush3.msra.mxu1 %v3651_v51 }
  0xb3   :  { %283 = vmatpush1.msra.mxu0 %v3536_v20  ;;  %2720 = vmatprep.subr.mxu1 %v3425_v2 }
  0xb4   :  { %284 = vmatprep.subr.mxu0 %v3540_v21  ;;  %2721 = vmatpush3.msra.mxu1 %v3657_v52 }
  0xb5   :  { %285 = vmatpush1.msra.mxu0 %v3544_v22  ;;  %2722 = vmatprep.subr.mxu1 %v3425_v2 }
  0xb6   :  { %286 = vmatprep.subr.mxu0 %v3548_v23  ;;  %2723 = vmatpush3.msra.mxu1 %v3663_v53 }
  0xb7   :  { %287 = vmatpush1.msra.mxu0 %v3552_v24  ;;  %2724 = vmatprep.subr.mxu1 %v3425_v2 }
  0xb8   :  { %288 = vmatprep.subr.mxu0 %v3556_v25  ;;  %2725 = vmatpush3.msra.mxu1 %v3669_v54 }
  0xb9   :  { %289 = vmatpush1.msra.mxu0 %v3560_v26  ;;  %2726 = vmatprep.subr.mxu1 %v3425_v2 }
  0xba   :  { %290 = vmatprep.subr.mxu0 %v3564_v27  ;;  %2727 = vmatpush3.msra.mxu1 %v3675_v55 }
  0xbb   :  { %291 = vmatpush1.msra.mxu0 %v3568_v28  ;;  %2728 = vmatprep.subr.mxu1 %v3425_v2 }
  0xbc   :  { %292 = vmatprep.subr.mxu0 %v3572_v29  ;;  %2729 = vmatpush3.msra.mxu1 %v3681_v56 }
  0xbd   :  { %293 = vmatpush1.msra.mxu0 %v3576_v30  ;;  %2730 = vmatprep.subr.mxu1 %v3425_v2 }
  0xbe   :  { %294 = vmatprep.subr.mxu0 %v3580_v31  ;;  %2731 = vmatpush3.msra.mxu1 %v3687_v57 }
  0xbf   :  { %295 = vmatpush1.msra.mxu0 %v3584_v32  ;;  %2732 = vmatprep.subr.mxu1 %v3425_v2 }
  0xc0   :  { %296 = vmatprep.subr.mxu0 %v3588_v33  ;;  %2733 = vmatpush3.msra.mxu1 %v3693_v58 }
  0xc1   :  { %297 = vmatpush1.msra.mxu0 %v3592_v34  ;;  %2734 = vmatprep.subr.mxu1 %v3425_v2 }
  0xc2   :  { %298 = vmatprep.subr.mxu0 %v3596_v35  ;;  %2735 = vmatpush3.msra.mxu1 %v3699_v59 }
  0xc3   :  { %299 = vmatpush1.msra.mxu0 %v3600_v36  ;;  %2736 = vmatprep.subr.mxu1 %v3425_v2 }
  0xc4   :  { %300 = vmatprep.subr.mxu0 %v3604_v37  ;;  %2737 = vmatpush3.msra.mxu1 %v3705_v61 }
  0xc5   :  { %301 = vmatpush1.msra.mxu0 %v3608_v38  ;;  %2738 = vmatprep.subr.mxu1 %v3425_v2 }
  0xc6   :  { %2415 = vmatmul.mubr.msk.f32.vlgmr.msra.gmra.mxu0 %vm267_vm2, %v3433_v46  ;;  %2739 = vmatpush3.msra.mxu1 %v3712_v62 }
  0xc7   :  { %419 = vmatprep.subr.mxu0 %v3486_v4  ;;  %2740 = vmatprep.subr.mxu1 %v3425_v2 }
  0xc8   :  { %420 = vmatpush1.msra.mxu0 %v3488_v5  ;;  %2741 = vmatpush3.msra.mxu1 %v3718_v63  ;;  %v715_v9 = vpop.permute.xlu0 %714 }
  0xc9   :  { %421 = vmatprep.subr.mxu0 %v3492_v6  ;;  %2742 = vmatprep.subr.mxu1 %v3425_v2  ;;  %vm716_vm6 = vcmp.eq.s32.totalorder %v3625_v44, %v715_v9 }
  0xca   :  { %422 = vmatpush1.msra.mxu0 %v3499_v7  ;;  %2743 = vmatpush3.msra.mxu1 %v3726_v0  ;;  %v865_v39 = vpop.permute.xlu1 %864 }
  0xcb   :  { %2744 = vmatprep.mubr.msk.f32.mxu1 %vm3434_vm3, %v3425_v2  ;;  %423 = vmatprep.subr.mxu0 %v3502_v10  ;;  %vm866_vm7 = vcmp.eq.s32.totalorder %v3625_v44, %v865_v39  ;;  %v4323_v39 = vld [vmem:[#allocation5 + $0xa0] sm:$0xff] }
  0xcc   :  { %2745 = vmatmul.mubr.msk.f32.vlgmr.msra.gmra.mxu1 %vm267_vm2, %v3433_v46  ;;  %424 = vmatpush1.msra.mxu0 %v3506_v11 }
  0xcd   :  { %2747 = vmatprep.subr.mxu1 %v3425_v2  ;;  %425 = vmatprep.subr.mxu0 %v3509_v12 }
  0xce   :  { %2748 = vmatpush3.msra.mxu1 %v3633_v48  ;;  %426 = vmatpush1.msra.mxu0 %v3513_v13 }
  0xcf   :  { %2749 = vmatprep.subr.mxu1 %v3425_v2  ;;  %427 = vmatprep.subr.mxu0 %v3517_v14 }
  0xd0   :  { %2750 = vmatpush3.msra.mxu1 %v3639_v49  ;;  %428 = vmatpush1.msra.mxu0 %v3521_v16 }
  0xd1   :  { %2751 = vmatprep.subr.mxu1 %v3425_v2  ;;  %429 = vmatprep.subr.mxu0 %v3525_v17 }
  0xd2   :  { %2752 = vmatpush3.msra.mxu1 %v3645_v50  ;;  %430 = vmatpush1.msra.mxu0 %v3528_v18 }
  0xd3   :  { %2753 = vmatprep.subr.mxu1 %v3425_v2  ;;  %431 = vmatprep.subr.mxu0 %v3532_v19 }
  0xd4   :  { %2754 = vmatpush3.msra.mxu1 %v3651_v51  ;;  %432 = vmatpush1.msra.mxu0 %v3536_v20 }
  0xd5   :  { %2755 = vmatprep.subr.mxu1 %v3425_v2  ;;  %433 = vmatprep.subr.mxu0 %v3540_v21 }
  0xd6   :  { %2756 = vmatpush3.msra.mxu1 %v3657_v52  ;;  %434 = vmatpush1.msra.mxu0 %v3544_v22 }
  0xd7   :  { %2757 = vmatprep.subr.mxu1 %v3425_v2  ;;  %435 = vmatprep.subr.mxu0 %v3548_v23 }
  0xd8   :  { %2758 = vmatpush3.msra.mxu1 %v3663_v53  ;;  %436 = vmatpush1.msra.mxu0 %v3552_v24 }
  0xd9   :  { %2759 = vmatprep.subr.mxu1 %v3425_v2  ;;  %437 = vmatprep.subr.mxu0 %v3556_v25 }
  0xda   :  { %2760 = vmatpush3.msra.mxu1 %v3669_v54  ;;  %438 = vmatpush1.msra.mxu0 %v3560_v26 }
  0xdb   :  { %2761 = vmatprep.subr.mxu1 %v3425_v2  ;;  %439 = vmatprep.subr.mxu0 %v3564_v27 }
  0xdc   :  { %2762 = vmatpush3.msra.mxu1 %v3675_v55  ;;  %440 = vmatpush1.msra.mxu0 %v3568_v28 }
  0xdd   :  { %2763 = vmatprep.subr.mxu1 %v3425_v2  ;;  %441 = vmatprep.subr.mxu0 %v3572_v29 }
  0xde   :  { %2764 = vmatpush3.msra.mxu1 %v3681_v56  ;;  %442 = vmatpush1.msra.mxu0 %v3576_v30 }
  0xdf   :  { %2765 = vmatprep.subr.mxu1 %v3425_v2  ;;  %443 = vmatprep.subr.mxu0 %v3580_v31 }
  0xe0   :  { %2766 = vmatpush3.msra.mxu1 %v3687_v57  ;;  %444 = vmatpush1.msra.mxu0 %v3584_v32 }
  0xe1   :  { %2767 = vmatprep.subr.mxu1 %v3425_v2  ;;  %445 = vmatprep.subr.mxu0 %v3588_v33 }
  0xe2   :  { %2768 = vmatpush3.msra.mxu1 %v3693_v58  ;;  %446 = vmatpush1.msra.mxu0 %v3592_v34 }
  0xe3   :  { %2769 = vmatprep.subr.mxu1 %v3425_v2  ;;  %447 = vmatprep.subr.mxu0 %v3596_v35 }
  0xe4   :  { %2770 = vmatpush3.msra.mxu1 %v3699_v59  ;;  %448 = vmatpush1.msra.mxu0 %v3600_v36 }
  0xe5   :  { %2771 = vmatprep.subr.mxu1 %v3425_v2  ;;  %449 = vmatprep.subr.mxu0 %v3604_v37 }
  0xe6   :  { %2772 = vmatpush3.msra.mxu1 %v3705_v61  ;;  %450 = vmatpush1.msra.mxu0 %v3608_v38 }
  0xe7   :  { %483 = vmatprep.mubr.f32.mxu0 %v3425_v2  ;;  %2773 = vmatprep.subr.mxu1 %v3425_v2 }
  0xe8   :  { %2418 = vmatmul.mubr.msk.f32.vlgmr.msra.gmra.mxu0 %vm416_vm4, %v3433_v46  ;;  %2774 = vmatpush3.msra.mxu1 %v3712_v62 }
  0xe9   :  { %569 = vmatprep.subr.mxu0 %v3486_v4  ;;  %2775 = vmatprep.subr.mxu1 %v3425_v2 }
  0xea   :  { %570 = vmatpush1.msra.mxu0 %v3488_v5  ;;  %2776 = vmatpush3.msra.mxu1 %v3718_v63 }
  0xeb   :  { %571 = vmatprep.subr.mxu0 %v3492_v6  ;;  %2777 = vmatprep.subr.mxu1 %v3425_v2 }
  0xec   :  { %572 = vmatpush1.msra.mxu0 %v3499_v7  ;;  %2778 = vmatpush3.msra.mxu1 %v3726_v0 }
  0xed   :  { %2779 = vmatprep.mubr.msk.f32.mxu1 %vm3434_vm3, %v3425_v2  ;;  %573 = vmatprep.subr.mxu0 %v3502_v10 }
  0xee   :  { %2780 = vmatmul.mubr.msk.f32.vlgmr.msra.gmra.mxu1 %vm416_vm4, %v3433_v46  ;;  %574 = vmatpush1.msra.mxu0 %v3506_v11 }
  0xef   :  { %2782 = vmatprep.subr.mxu1 %v3425_v2  ;;  %575 = vmatprep.subr.mxu0 %v3509_v12 }
  0xf0   :  { %2783 = vmatpush3.msra.mxu1 %v3633_v48  ;;  %576 = vmatpush1.msra.mxu0 %v3513_v13 }
  0xf1   :  { %2784 = vmatprep.subr.mxu1 %v3425_v2  ;;  %577 = vmatprep.subr.mxu0 %v3517_v14 }
  0xf2   :  { %2785 = vmatpush3.msra.mxu1 %v3639_v49  ;;  %578 = vmatpush1.msra.mxu0 %v3521_v16 }
  0xf3   :  { %2786 = vmatprep.subr.mxu1 %v3425_v2  ;;  %579 = vmatprep.subr.mxu0 %v3525_v17 }
  0xf4   :  { %2787 = vmatpush3.msra.mxu1 %v3645_v50  ;;  %580 = vmatpush1.msra.mxu0 %v3528_v18 }
  0xf5   :  { %2788 = vmatprep.subr.mxu1 %v3425_v2  ;;  %581 = vmatprep.subr.mxu0 %v3532_v19 }
  0xf6   :  { %2789 = vmatpush3.msra.mxu1 %v3651_v51  ;;  %582 = vmatpush1.msra.mxu0 %v3536_v20 }
  0xf7   :  { %2790 = vmatprep.subr.mxu1 %v3425_v2  ;;  %583 = vmatprep.subr.mxu0 %v3540_v21 }
  0xf8   :  { %2791 = vmatpush3.msra.mxu1 %v3657_v52  ;;  %584 = vmatpush1.msra.mxu0 %v3544_v22 }
  0xf9   :  { %2792 = vmatprep.subr.mxu1 %v3425_v2  ;;  %585 = vmatprep.subr.mxu0 %v3548_v23 }
  0xfa   :  { %2793 = vmatpush3.msra.mxu1 %v3663_v53  ;;  %586 = vmatpush1.msra.mxu0 %v3552_v24 }
  0xfb   :  { %2794 = vmatprep.subr.mxu1 %v3425_v2  ;;  %587 = vmatprep.subr.mxu0 %v3556_v25 }
  0xfc   :  { %2795 = vmatpush3.msra.mxu1 %v3669_v54  ;;  %588 = vmatpush1.msra.mxu0 %v3560_v26 }
  0xfd   :  { %2796 = vmatprep.subr.mxu1 %v3425_v2  ;;  %589 = vmatprep.subr.mxu0 %v3564_v27 }
  0xfe   :  { %2797 = vmatpush3.msra.mxu1 %v3675_v55  ;;  %590 = vmatpush1.msra.mxu0 %v3568_v28 }
  0xff   :  { %2798 = vmatprep.subr.mxu1 %v3425_v2  ;;  %591 = vmatprep.subr.mxu0 %v3572_v29 }
 0x100   :  { %2799 = vmatpush3.msra.mxu1 %v3681_v56  ;;  %592 = vmatpush1.msra.mxu0 %v3576_v30 }
 0x101   :  { %2800 = vmatprep.subr.mxu1 %v3425_v2  ;;  %593 = vmatprep.subr.mxu0 %v3580_v31 }
 0x102   :  { %2801 = vmatpush3.msra.mxu1 %v3687_v57  ;;  %594 = vmatpush1.msra.mxu0 %v3584_v32 }
 0x103   :  { %2802 = vmatprep.subr.mxu1 %v3425_v2  ;;  %595 = vmatprep.subr.mxu0 %v3588_v33 }
 0x104   :  { %2803 = vmatpush3.msra.mxu1 %v3693_v58  ;;  %596 = vmatpush1.msra.mxu0 %v3592_v34 }
 0x105   :  { %2804 = vmatprep.subr.mxu1 %v3425_v2  ;;  %597 = vmatprep.subr.mxu0 %v3596_v35 }
 0x106   :  { %2805 = vmatpush3.msra.mxu1 %v3699_v59  ;;  %598 = vmatpush1.msra.mxu0 %v3600_v36 }
 0x107   :  { %2806 = vmatprep.subr.mxu1 %v3425_v2  ;;  %599 = vmatprep.subr.mxu0 %v3604_v37 }
 0x108   :  { %2807 = vmatpush3.msra.mxu1 %v3705_v61  ;;  %600 = vmatpush1.msra.mxu0 %v3608_v38 }
 0x109   :  { %633 = vmatprep.mubr.f32.mxu0 %v3425_v2  ;;  %2808 = vmatprep.subr.mxu1 %v3425_v2 }
 0x10a   :  { %2421 = vmatmul.mubr.msk.f32.vlgmr.msra.gmra.mxu0 %vm566_vm5, %v3433_v46  ;;  %2809 = vmatpush3.msra.mxu1 %v3712_v62 }
 0x10b   :  { %719 = vmatprep.subr.mxu0 %v3486_v4  ;;  %2810 = vmatprep.subr.mxu1 %v3425_v2 }
 0x10c   :  { %720 = vmatpush1.msra.mxu0 %v3488_v5  ;;  %2811 = vmatpush3.msra.mxu1 %v3718_v63 }
 0x10d   :  { %721 = vmatprep.subr.mxu0 %v3492_v6  ;;  %2812 = vmatprep.subr.mxu1 %v3425_v2 }
 0x10e   :  { %722 = vmatpush1.msra.mxu0 %v3499_v7  ;;  %2813 = vmatpush3.msra.mxu1 %v3726_v0 }
 0x10f   :  { %2814 = vmatprep.mubr.msk.f32.mxu1 %vm3434_vm3, %v3425_v2  ;;  %723 = vmatprep.subr.mxu0 %v3502_v10 }
 0x110   :  { %2815 = vmatmul.mubr.msk.f32.vlgmr.msra.gmra.mxu1 %vm566_vm5, %v3433_v46  ;;  %724 = vmatpush1.msra.mxu0 %v3506_v11 }
 0x111   :  { %2817 = vmatprep.subr.mxu1 %v3425_v2  ;;  %725 = vmatprep.subr.mxu0 %v3509_v12 }
 0x112   :  { %2818 = vmatpush3.msra.mxu1 %v3633_v48  ;;  %726 = vmatpush1.msra.mxu0 %v3513_v13 }
 0x113   :  { %2819 = vmatprep.subr.mxu1 %v3425_v2  ;;  %727 = vmatprep.subr.mxu0 %v3517_v14 }
 0x114   :  { %2820 = vmatpush3.msra.mxu1 %v3639_v49  ;;  %728 = vmatpush1.msra.mxu0 %v3521_v16 }
 0x115   :  { %2821 = vmatprep.subr.mxu1 %v3425_v2  ;;  %729 = vmatprep.subr.mxu0 %v3525_v17 }
 0x116   :  { %2822 = vmatpush3.msra.mxu1 %v3645_v50  ;;  %730 = vmatpush1.msra.mxu0 %v3528_v18 }
 0x117   :  { %2823 = vmatprep.subr.mxu1 %v3425_v2  ;;  %731 = vmatprep.subr.mxu0 %v3532_v19 }
 0x118   :  { %2824 = vmatpush3.msra.mxu1 %v3651_v51  ;;  %732 = vmatpush1.msra.mxu0 %v3536_v20 }
 0x119   :  { %2825 = vmatprep.subr.mxu1 %v3425_v2  ;;  %733 = vmatprep.subr.mxu0 %v3540_v21 }
 0x11a   :  { %2826 = vmatpush3.msra.mxu1 %v3657_v52  ;;  %734 = vmatpush1.msra.mxu0 %v3544_v22 }
 0x11b   :  { %2827 = vmatprep.subr.mxu1 %v3425_v2  ;;  %735 = vmatprep.subr.mxu0 %v3548_v23 }
 0x11c   :  { %2828 = vmatpush3.msra.mxu1 %v3663_v53  ;;  %736 = vmatpush1.msra.mxu0 %v3552_v24 }
 0x11d   :  { %2829 = vmatprep.subr.mxu1 %v3425_v2  ;;  %737 = vmatprep.subr.mxu0 %v3556_v25 }
 0x11e   :  { %2830 = vmatpush3.msra.mxu1 %v3669_v54  ;;  %738 = vmatpush1.msra.mxu0 %v3560_v26 }
 0x11f   :  { %2831 = vmatprep.subr.mxu1 %v3425_v2  ;;  %739 = vmatprep.subr.mxu0 %v3564_v27 }
 0x120   :  { %2832 = vmatpush3.msra.mxu1 %v3675_v55  ;;  %740 = vmatpush1.msra.mxu0 %v3568_v28 }
 0x121   :  { %2833 = vmatprep.subr.mxu1 %v3425_v2  ;;  %741 = vmatprep.subr.mxu0 %v3572_v29 }
 0x122   :  { %2834 = vmatpush3.msra.mxu1 %v3681_v56  ;;  %742 = vmatpush1.msra.mxu0 %v3576_v30 }
 0x123   :  { %2835 = vmatprep.subr.mxu1 %v3425_v2  ;;  %743 = vmatprep.subr.mxu0 %v3580_v31 }
 0x124   :  { %2836 = vmatpush3.msra.mxu1 %v3687_v57  ;;  %744 = vmatpush1.msra.mxu0 %v3584_v32 }
 0x125   :  { %2837 = vmatprep.subr.mxu1 %v3425_v2  ;;  %745 = vmatprep.subr.mxu0 %v3588_v33 }
 0x126   :  { %2838 = vmatpush3.msra.mxu1 %v3693_v58  ;;  %746 = vmatpush1.msra.mxu0 %v3592_v34 }
 0x127   :  { %2839 = vmatprep.subr.mxu1 %v3425_v2  ;;  %747 = vmatprep.subr.mxu0 %v3596_v35 }
 0x128   :  { %2840 = vmatpush3.msra.mxu1 %v3699_v59  ;;  %748 = vmatpush1.msra.mxu0 %v3600_v36 }
 0x129   :  { %2841 = vmatprep.subr.mxu1 %v3425_v2  ;;  %749 = vmatprep.subr.mxu0 %v3604_v37 }
 0x12a   :  { %2842 = vmatpush3.msra.mxu1 %v3705_v61  ;;  %750 = vmatpush1.msra.mxu0 %v3608_v38 }
 0x12b   :  { %783 = vmatprep.mubr.f32.mxu0 %v3425_v2  ;;  %2843 = vmatprep.subr.mxu1 %v3425_v2 }
 0x12c   :  { %2424 = vmatmul.mubr.msk.f32.vlgmr.msra.gmra.mxu0 %vm716_vm6, %v3433_v46  ;;  %2844 = vmatpush3.msra.mxu1 %v3712_v62 }
 0x12d   :  { %869 = vmatprep.subr.mxu0 %v3486_v4  ;;  %2845 = vmatprep.subr.mxu1 %v3425_v2 }
 0x12e   :  { %870 = vmatpush1.msra.mxu0 %v3488_v5  ;;  %2846 = vmatpush3.msra.mxu1 %v3718_v63 }
 0x12f   :  { %871 = vmatprep.subr.mxu0 %v3492_v6  ;;  %2847 = vmatprep.subr.mxu1 %v3425_v2 }
 0x130   :  { %872 = vmatpush1.msra.mxu0 %v3499_v7  ;;  %2848 = vmatpush3.msra.mxu1 %v3726_v0 }
 0x131   :  { %2849 = vmatprep.mubr.msk.f32.mxu1 %vm3434_vm3, %v3425_v2  ;;  %873 = vmatprep.subr.mxu0 %v3502_v10 }
 0x132   :  { %2850 = vmatmul.mubr.msk.f32.vlgmr.msra.gmra.mxu1 %vm716_vm6, %v3433_v46  ;;  %874 = vmatpush1.msra.mxu0 %v3506_v11 }
 0x133   :  { %2852 = vmatprep.subr.mxu1 %v3425_v2  ;;  %875 = vmatprep.subr.mxu0 %v3509_v12 }
 0x134   :  { %2853 = vmatpush3.msra.mxu1 %v3633_v48  ;;  %876 = vmatpush1.msra.mxu0 %v3513_v13 }
 0x135   :  { %2854 = vmatprep.subr.mxu1 %v3425_v2  ;;  %877 = vmatprep.subr.mxu0 %v3517_v14 }
 0x136   :  { %2855 = vmatpush3.msra.mxu1 %v3639_v49  ;;  %878 = vmatpush1.msra.mxu0 %v3521_v16 }
 0x137   :  { %2856 = vmatprep.subr.mxu1 %v3425_v2  ;;  %879 = vmatprep.subr.mxu0 %v3525_v17 }
 0x138   :  { %2857 = vmatpush3.msra.mxu1 %v3645_v50  ;;  %880 = vmatpush1.msra.mxu0 %v3528_v18 }
 0x139   :  { %2858 = vmatprep.subr.mxu1 %v3425_v2  ;;  %881 = vmatprep.subr.mxu0 %v3532_v19 }
 0x13a   :  { %2859 = vmatpush3.msra.mxu1 %v3651_v51  ;;  %882 = vmatpush1.msra.mxu0 %v3536_v20 }
 0x13b   :  { %2860 = vmatprep.subr.mxu1 %v3425_v2  ;;  %883 = vmatprep.subr.mxu0 %v3540_v21 }
 0x13c   :  { %2861 = vmatpush3.msra.mxu1 %v3657_v52  ;;  %884 = vmatpush1.msra.mxu0 %v3544_v22 }
 0x13d   :  { %2862 = vmatprep.subr.mxu1 %v3425_v2  ;;  %885 = vmatprep.subr.mxu0 %v3548_v23 }
 0x13e   :  { %2863 = vmatpush3.msra.mxu1 %v3663_v53  ;;  %886 = vmatpush1.msra.mxu0 %v3552_v24 }
 0x13f   :  { %2864 = vmatprep.subr.mxu1 %v3425_v2  ;;  %887 = vmatprep.subr.mxu0 %v3556_v25 }
 0x140   :  { %2865 = vmatpush3.msra.mxu1 %v3669_v54  ;;  %888 = vmatpush1.msra.mxu0 %v3560_v26 }
 0x141   :  { %2866 = vmatprep.subr.mxu1 %v3425_v2  ;;  %889 = vmatprep.subr.mxu0 %v3564_v27 }
 0x142   :  { %2867 = vmatpush3.msra.mxu1 %v3675_v55  ;;  %890 = vmatpush1.msra.mxu0 %v3568_v28 }
 0x143   :  { %2868 = vmatprep.subr.mxu1 %v3425_v2  ;;  %891 = vmatprep.subr.mxu0 %v3572_v29 }
 0x144   :  { %2869 = vmatpush3.msra.mxu1 %v3681_v56  ;;  %892 = vmatpush1.msra.mxu0 %v3576_v30 }
 0x145   :  { %2870 = vmatprep.subr.mxu1 %v3425_v2  ;;  %893 = vmatprep.subr.mxu0 %v3580_v31 }
 0x146   :  { %2871 = vmatpush3.msra.mxu1 %v3687_v57  ;;  %894 = vmatpush1.msra.mxu0 %v3584_v32 }
 0x147   :  { %2872 = vmatprep.subr.mxu1 %v3425_v2  ;;  %895 = vmatprep.subr.mxu0 %v3588_v33 }
 0x148   :  { %2873 = vmatpush3.msra.mxu1 %v3693_v58  ;;  %896 = vmatpush1.msra.mxu0 %v3592_v34 }
 0x149   :  { %2874 = vmatprep.subr.mxu1 %v3425_v2  ;;  %897 = vmatprep.subr.mxu0 %v3596_v35 }
 0x14a   :  { %2875 = vmatpush3.msra.mxu1 %v3699_v59  ;;  %898 = vmatpush1.msra.mxu0 %v3600_v36 }
 0x14b   :  { %2876 = vmatprep.subr.mxu1 %v3425_v2  ;;  %899 = vmatprep.subr.mxu0 %v3604_v37 }
 0x14c   :  { %2877 = vmatpush3.msra.mxu1 %v3705_v61  ;;  %900 = vmatpush1.msra.mxu0 %v3608_v38 }
 0x14d   :  { %933 = vmatprep.mubr.f32.mxu0 %v3425_v2  ;;  %2878 = vmatprep.subr.mxu1 %v3425_v2 }
 0x14e   :  { %2427 = vmatmul.mubr.msk.f32.vlgmr.msra.gmra.mxu0 %vm866_vm7, %v3433_v46  ;;  %2879 = vmatpush3.msra.mxu1 %v3712_v62 }
 0x14f   :  { %1019 = vmatprep.subr.mxu0 %v3486_v4  ;;  %2880 = vmatprep.subr.mxu1 %v3425_v2 }
 0x150   :  { %1020 = vmatpush1.msra.mxu0 %v3488_v5  ;;  %2881 = vmatpush3.msra.mxu1 %v3718_v63 }
 0x151   :  { %1021 = vmatprep.subr.mxu0 %v3492_v6  ;;  %2882 = vmatprep.subr.mxu1 %v3425_v2  ;;  %v1015_v6 = vpop.permute.xlu1 %1014 }
 0x152   :  { %1022 = vmatpush1.msra.mxu0 %v3499_v7  ;;  %2883 = vmatpush3.msra.mxu1 %v3726_v0  ;;  %vm1016_vm8 = vcmp.eq.s32.totalorder %v3625_v44, %v1015_v6  ;;  %v4337_v6 = vld [vmem:[#allocation5 + $0x70] sm:$0xff] }
 0x153   :  { %2884 = vmatprep.mubr.msk.f32.mxu1 %vm3434_vm3, %v3425_v2  ;;  %1023 = vmatprep.subr.mxu0 %v3502_v10 }
 0x154   :  { %2885 = vmatmul.mubr.msk.f32.vlgmr.msra.gmra.mxu1 %vm866_vm7, %v3433_v46  ;;  %1024 = vmatpush1.msra.mxu0 %v3506_v11  ;;  %v4102_v11 = vld [vmem:[#allocation5 + $0x170] sm:$0xff] }
 0x155   :  { %2887 = vmatprep.subr.mxu1 %v3425_v2  ;;  %1025 = vmatprep.subr.mxu0 %v3509_v12  ;;  %v4106_v12 = vld [vmem:[#allocation5 + $0x168] sm:$0xff] }
 0x156   :  { %2888 = vmatpush3.msra.mxu1 %v3633_v48  ;;  %1026 = vmatpush1.msra.mxu0 %v3513_v13  ;;  %v3437_v13 = vmov 11  }
 0x157   :  { %2889 = vmatprep.subr.mxu1 %v3425_v2  ;;  %1027 = vmatprep.subr.mxu0 %v3517_v14  ;;  %v4110_v14 = vld [vmem:[#allocation5 + $0x158] sm:$0xff] }
 0x158   :  { %2890 = vmatpush3.msra.mxu1 %v3639_v49  ;;  %1028 = vmatpush1.msra.mxu0 %v3521_v16  ;;  %v4113_v16 = vld [vmem:[#allocation2] sm:$0xff] }
 0x159   :  { %2891 = vmatprep.subr.mxu1 %v3425_v2  ;;  %1029 = vmatprep.subr.mxu0 %v3525_v17  ;;  %v4117_v17 = vld [vmem:[#allocation5 + $0x150] sm:$0xff] }
 0x15a   :  { %2892 = vmatpush3.msra.mxu1 %v3645_v50  ;;  %1030 = vmatpush1.msra.mxu0 %v3528_v18  ;;  %v4123_v18 = vld [vmem:[#allocation5 + $0x140] sm:$0xff] }
 0x15b   :  { %2893 = vmatprep.subr.mxu1 %v3425_v2  ;;  %1031 = vmatprep.subr.mxu0 %v3532_v19  ;;  %v4129_v19 = vld [vmem:[#allocation5 + $0x138] sm:$0xff] }
 0x15c   :  { %2894 = vmatpush3.msra.mxu1 %v3651_v51  ;;  %1032 = vmatpush1.msra.mxu0 %v3536_v20  ;;  %v4133_v20 = vld [vmem:[#allocation5 + $0x128] sm:$0xff] }
 0x15d   :  { %2895 = vmatprep.subr.mxu1 %v3425_v2  ;;  %1033 = vmatprep.subr.mxu0 %v3540_v21  ;;  %v4137_v21 = vld [vmem:[#allocation5 + $0x120] sm:$0xff] }
 0x15e   :  { %2896 = vmatpush3.msra.mxu1 %v3657_v52  ;;  %1034 = vmatpush1.msra.mxu0 %v3544_v22  ;;  %v4141_v22 = vld [vmem:[#allocation5 + $0x110] sm:$0xff] }
 0x15f   :  { %2897 = vmatprep.subr.mxu1 %v3425_v2  ;;  %1035 = vmatprep.subr.mxu0 %v3548_v23  ;;  %v4145_v23 = vld [vmem:[#allocation5 + $0x108] sm:$0xff] }
 0x160   :  { %2898 = vmatpush3.msra.mxu1 %v3663_v53  ;;  %1036 = vmatpush1.msra.mxu0 %v3552_v24  ;;  %v4149_v24 = vld [vmem:[#allocation5 + $0xf8] sm:$0xff] }
 0x161   :  { %2899 = vmatprep.subr.mxu1 %v3425_v2  ;;  %1037 = vmatprep.subr.mxu0 %v3556_v25  ;;  %v4153_v25 = vld [vmem:[#allocation5 + $0xf0] sm:$0xff] }
 0x162   :  { %2900 = vmatpush3.msra.mxu1 %v3669_v54  ;;  %1038 = vmatpush1.msra.mxu0 %v3560_v26  ;;  %v4157_v26 = vld [vmem:[#allocation5 + $0xe0] sm:$0xff] }
 0x163   :  { %2901 = vmatprep.subr.mxu1 %v3425_v2  ;;  %1039 = vmatprep.subr.mxu0 %v3564_v27  ;;  %v4161_v27 = vld [vmem:[#allocation5 + $0xd8] sm:$0xff] }
 0x164   :  { %2902 = vmatpush3.msra.mxu1 %v3675_v55  ;;  %1040 = vmatpush1.msra.mxu0 %v3568_v28  ;;  %v4165_v28 = vld [vmem:[#allocation5 + $0xc8] sm:$0xff] }
 0x165   :  { %2903 = vmatprep.subr.mxu1 %v3425_v2  ;;  %1041 = vmatprep.subr.mxu0 %v3572_v29  ;;  %v4169_v29 = vld [vmem:[#allocation5 + $0xc0] sm:$0xff] }
 0x166   :  { %v183_v3 = vpop.f32.mrf.mxu0  ;;  %2904 = vmatpush3.msra.mxu1 %v3681_v56  ;;  %1042 = vmatpush1.msra.mxu0 %v3576_v30  ;;  %v4173_v30 = vld [vmem:[#allocation5 + $0xb0] sm:$0xff] }
 0x167   :  { %2905 = vmatprep.subr.mxu1 %v3425_v2  ;;  %1043 = vmatprep.subr.mxu0 %v3580_v31  ;;  %v4177_v31 = vld [vmem:[#allocation5 + $0xa8] sm:$0xff] }
 0x168   :  { %v185_v4 = vpop.f32.mrf.mxu0  ;;  %2906 = vmatpush3.msra.mxu1 %v3687_v57  ;;  %1044 = vmatpush1.msra.mxu0 %v3584_v32  ;;  %v4181_v32 = vld [vmem:[#allocation5 + $0x98] sm:$0xff] }
 0x169   :  { %2907 = vmatprep.subr.mxu1 %v3425_v2  ;;  %1045 = vmatprep.subr.mxu0 %v3588_v33  ;;  %v4185_v33 = vld [vmem:[#allocation5 + $0x90] sm:$0xff]  ;;  %v4331_v4 = vld [vmem:[#allocation5 + $0x88] sm:$0xff] }
 0x16a   :  { %2908 = vmatpush3.msra.mxu1 %v3693_v58  ;;  %1046 = vmatpush1.msra.mxu0 %v3592_v34  ;;  %v4189_v34 = vld [vmem:[#allocation5 + $0x80] sm:$0xff] }
 0x16b   :  { %v4081_v5 = vpop.f32.mrf.mxu1  ;;  %2909 = vmatprep.subr.mxu1 %v3425_v2  ;;  %1047 = vmatprep.subr.mxu0 %v3596_v35  ;;  %v4193_v35 = vld [vmem:[#allocation5 + $0x78] sm:$0xff] }
 0x16c   :  { %2910 = vmatpush3.msra.mxu1 %v3699_v59  ;;  %1048 = vmatpush1.msra.mxu0 %v3600_v36  ;;  %v4197_v36 = vld [vmem:[#allocation5 + $0x68] sm:$0xff] }
 0x16d   :  { %v261_v7 = vpop.f32.mrf.mxu1  ;;  %2911 = vmatprep.subr.mxu1 %v3425_v2  ;;  %1049 = vmatprep.subr.mxu0 %v3604_v37  ;;  %v4201_v37 = vld [vmem:[#allocation5 + $0x60] sm:$0xff] }
 0x16e   :  { %v4089_v10 = vadd.f32 %v261_v7, %v183_v3  ;;  %2912 = vmatpush3.msra.mxu1 %v3705_v61  ;;  %1050 = vmatpush1.msra.mxu0 %v3608_v38  ;;  %v4205_v38 = vld [vmem:[#allocation5 + $0x50] sm:$0xff]  ;;  %v4344_v7 = vld [vmem:[#allocation5 + $0x58] sm:$0xff] }
 0x16f   :  { %1083 = vmatprep.mubr.f32.mxu0 %v3425_v2  ;;  %2913 = vmatprep.subr.mxu1 %v3425_v2 }
 0x170   :  { %2430 = vmatmul.mubr.msk.f32.vlgmr.msra.gmra.mxu0 %vm1016_vm8, %v3433_v46  ;;  %2914 = vmatpush3.msra.mxu1 %v3712_v62 }
 0x171   :  { %1169 = vmatprep.subr.mxu0 %v4102_v11  ;;  %2915 = vmatprep.subr.mxu1 %v3425_v2 }
 0x172   :  { %1170 = vmatpush1.msra.mxu0 %v4106_v12  ;;  %3275 = vset.pattern.permute.xlu0 %v3437_v13  ;;  %v3439_v13 = vmov 13  }
 0x173   :  { %2916 = vmatpush3.msra.mxu1 %v3718_v63  ;;  %1171 = vmatprep.subr.mxu0 %v4110_v14 }
 0x174   :  { %1614 = vperm.xlu0 %3275, %v4113_v16   ;;  %2917 = vmatprep.subr.mxu1 %v3425_v2 }
 0x175   :  { %1172 = vmatpush1.msra.mxu0 %v4117_v17  ;;  %2918 = vmatpush3.msra.mxu1 %v3726_v0 }
 0x176   :  { %2919 = vmatprep.mubr.msk.f32.mxu1 %vm3434_vm3, %v3425_v2  ;;  %1173 = vmatprep.subr.mxu0 %v4123_v18 }
 0x177   :  { %2920 = vmatmul.mubr.msk.f32.vlgmr.msra.gmra.mxu1 %vm1016_vm8, %v3433_v46  ;;  %1174 = vmatpush1.msra.mxu0 %v4129_v19 }
 0x178   :  { %2922 = vmatprep.subr.mxu1 %v3425_v2  ;;  %1175 = vmatprep.subr.mxu0 %v4133_v20 }
 0x179   :  { %2923 = vmatpush3.msra.mxu1 %v3633_v48  ;;  %1176 = vmatpush1.msra.mxu0 %v4137_v21  ;;  %v4220_v48 = vld [vmem:[#allocation5 + $0x30] sm:$0xff] }
 0x17a   :  { %2924 = vmatprep.subr.mxu1 %v3425_v2  ;;  %1177 = vmatprep.subr.mxu0 %v4141_v22 }
 0x17b   :  { %2925 = vmatpush3.msra.mxu1 %v3639_v49  ;;  %1178 = vmatpush1.msra.mxu0 %v4145_v23  ;;  %v1165_v49 = vpop.permute.xlu0 %1164 }
 0x17c   :  { %2926 = vmatprep.subr.mxu1 %v3425_v2  ;;  %1179 = vmatprep.subr.mxu0 %v4149_v24  ;;  %vm1166_vm9 = vcmp.eq.s32.totalorder %v3625_v44, %v1165_v49 }
 0x17d   :  { %2927 = vmatpush3.msra.mxu1 %v3645_v50  ;;  %1180 = vmatpush1.msra.mxu0 %v4153_v25  ;;  %v4224_v50 = vld [vmem:[#allocation5 + $0x20] sm:$0xff] }
 0x17e   :  { %2928 = vmatprep.subr.mxu1 %v3425_v2  ;;  %1181 = vmatprep.subr.mxu0 %v4157_v26 }
 0x17f   :  { %2929 = vmatpush3.msra.mxu1 %v3651_v51  ;;  %1182 = vmatpush1.msra.mxu0 %v4161_v27  ;;  %v4228_v51 = vld [vmem:[#allocation5 + $0x18] sm:$0xff] }
 0x180   :  { %2930 = vmatprep.subr.mxu1 %v3425_v2  ;;  %1183 = vmatprep.subr.mxu0 %v4165_v28 }
 0x181   :  { %2931 = vmatpush3.msra.mxu1 %v3657_v52  ;;  %1184 = vmatpush1.msra.mxu0 %v4169_v29  ;;  %v4232_v52 = vld [vmem:[#allocation5 + $0x8] sm:$0xff] }
 0x182   :  { %2932 = vmatprep.subr.mxu1 %v3425_v2  ;;  %1185 = vmatprep.subr.mxu0 %v4173_v30 }
 0x183   :  { %2933 = vmatpush3.msra.mxu1 %v3663_v53  ;;  %1186 = vmatpush1.msra.mxu0 %v4177_v31  ;;  %v4237_v53 = vld [vmem:[#allocation5] sm:$0xff] }
 0x184   :  { %2934 = vmatprep.subr.mxu1 %v3425_v2  ;;  %1187 = vmatprep.subr.mxu0 %v4181_v32 }
 0x185   :  { %2935 = vmatpush3.msra.mxu1 %v3669_v54  ;;  %1188 = vmatpush1.msra.mxu0 %v4185_v33  ;;  %v3438_v54 = vmov 12  }
 0x186   :  { %2936 = vmatprep.subr.mxu1 %v3425_v2  ;;  %1189 = vmatprep.subr.mxu0 %v4189_v34 }
 0x187   :  { %2937 = vmatpush3.msra.mxu1 %v3675_v55  ;;  %1190 = vmatpush1.msra.mxu0 %v4193_v35  ;;  %v4264_v55 = vld [vmem:[#allocation5 + $0x178] sm:$0xff] }
 0x188   :  { %2938 = vmatprep.subr.mxu1 %v3425_v2  ;;  %1191 = vmatprep.subr.mxu0 %v4197_v36 }
 0x189   :  { %2939 = vmatpush3.msra.mxu1 %v3681_v56  ;;  %1192 = vmatpush1.msra.mxu0 %v4201_v37  ;;  %v4270_v56 = vld [vmem:[#allocation5 + $0x160] sm:$0xff] }
 0x18a   :  { %2940 = vmatprep.subr.mxu1 %v3425_v2  ;;  %1193 = vmatprep.subr.mxu0 %v4205_v38 }
 0x18b   :  { %2941 = vmatpush3.msra.mxu1 %v3687_v57  ;;  %1194 = vmatpush1.msra.mxu0 %v4209_v42  ;;  %v4276_v57 = vld [vmem:[#allocation5 + $0x148] sm:$0xff] }
 0x18c   :  { %v407_v41 = vpop.f32.mrf.mxu1  ;;  %2942 = vmatprep.subr.mxu1 %v3425_v2  ;;  %1195 = vmatprep.subr.mxu0 %v4216_v45 }
 0x18d   :  { %v4213_v43 = vadd.f32 %v4089_v10, %v407_v41  ;;  %2943 = vmatpush3.msra.mxu1 %v3693_v58  ;;  %1196 = vmatpush1.msra.mxu0 %v4220_v48  ;;  %v4282_v58 = vld [vmem:[#allocation5 + $0x130] sm:$0xff]  ;;  %v4353_v10 = vld [vmem:[#allocation5 + $0x40] sm:$0xff]  ;;  %v4359_v41 = vld [vmem:[#allocation5 + $0x28] sm:$0xff] }
 0x18e   :  { %v2746_v47 = vpop.f32.mrf.mxu1  ;;  %2944 = vmatprep.subr.mxu1 %v3425_v2  ;;  %1197 = vmatprep.subr.mxu0 %v4224_v50 }
 0x18f   :  { %2945 = vmatpush3.msra.mxu1 %v3699_v59  ;;  %1198 = vmatpush1.msra.mxu0 %v4228_v51  ;;  %v4288_v59 = vpop.f32.mrf.mxu0  ;;  %v4366_v47 = vld [vmem:[#allocation5 + $0x10] sm:$0xff] }
 0x190   :  { %2946 = vmatprep.subr.mxu1 %v3425_v2  ;;  %1199 = vmatprep.subr.mxu0 %v4232_v52 }
 0x191   :  { %2947 = vmatpush3.msra.mxu1 %v3705_v61  ;;  %1200 = vmatpush1.msra.mxu0 %v4237_v53  ;;  %v4296_v61 = vld [vmem:[#allocation5 + $0x100] sm:$0xff] }
 0x192   :  { %1233 = vmatprep.mubr.f32.mxu0 %v3425_v2  ;;  %2948 = vmatprep.subr.mxu1 %v3425_v2 }
 0x193   :  { %2433 = vmatmul.mubr.msk.f32.vlgmr.msra.gmra.mxu0 %vm1166_vm9, %v3433_v46  ;;  %2949 = vmatpush3.msra.mxu1 %v3712_v62  ;;  %v338_v62 = vpop.f32.mrf.mxu0 }
 0x194   :  { %1319 = vmatprep.subr.mxu0 %v4102_v11  ;;  %2950 = vmatprep.subr.mxu1 %v3425_v2  ;;  %v560_v1 = vadd.f32 %v338_v62, %v4081_v5  ;;  %v1315_v5 = vpop.permute.xlu1 %1314 }
 0x195   :  { %1320 = vmatpush1.msra.mxu0 %v4106_v12  ;;  %3276 = vset.pattern.permute.xlu1 %v3438_v54  ;;  %vm1316_vm10 = vcmp.eq.s32.totalorder %v3625_v44, %v1315_v5 }
 0x196   :  { %2951 = vmatpush3.msra.mxu1 %v3718_v63  ;;  %1321 = vmatprep.subr.mxu0 %v4110_v14  ;;  %v4302_v63 = vld [vmem:[#allocation5 + $0xe8] sm:$0xff] }
 0x197   :  { %1764 = vperm.xlu1 %3276, %v4113_v16   ;;  %2952 = vmatprep.subr.mxu1 %v3425_v2 }
 0x198   :  { %1322 = vmatpush1.msra.mxu0 %v4117_v17  ;;  %2953 = vmatpush3.msra.mxu1 %v3726_v0  ;;  %v4308_v0 = vld [vmem:[#allocation5 + $0xd0] sm:$0xff]  ;;  %v1465_v5 = vpop.permute.xlu1 %1464 }
 0x199   :  { %2954 = vmatprep.mubr.msk.f32.mxu1 %vm3434_vm3, %v3425_v2  ;;  %1323 = vmatprep.subr.mxu0 %v4123_v18  ;;  %vm1466_vm11 = vcmp.eq.s32.totalorder %v3625_v44, %v1465_v5 }
 0x19a   :  { %2955 = vmatmul.mubr.msk.f32.vlgmr.msra.gmra.mxu1 %vm1166_vm9, %v3433_v46  ;;  %1324 = vmatpush1.msra.mxu0 %v4129_v19 }
 0x19b   :  { %2957 = vmatprep.subr.mxu1 %v3425_v2  ;;  %1325 = vmatprep.subr.mxu0 %v4133_v20 }
 0x19c   :  { %2958 = vmatpush3.msra.mxu1 %v4264_v55  ;;  %1326 = vmatpush1.msra.mxu0 %v4137_v21 }
 0x19d   :  { %2959 = vmatprep.subr.mxu1 %v3425_v2  ;;  %1327 = vmatprep.subr.mxu0 %v4141_v22 }
 0x19e   :  { %2960 = vmatpush3.msra.mxu1 %v4270_v56  ;;  %1328 = vmatpush1.msra.mxu0 %v4145_v23 }
 0x19f   :  { %2961 = vmatprep.subr.mxu1 %v3425_v2  ;;  %1329 = vmatprep.subr.mxu0 %v4149_v24 }
 0x1a0   :  { %2962 = vmatpush3.msra.mxu1 %v4276_v57  ;;  %1330 = vmatpush1.msra.mxu0 %v4153_v25 }
 0x1a1   :  { %2963 = vmatprep.subr.mxu1 %v3425_v2  ;;  %1331 = vmatprep.subr.mxu0 %v4157_v26 }
 0x1a2   :  { %2964 = vmatpush3.msra.mxu1 %v4282_v58  ;;  %1332 = vmatpush1.msra.mxu0 %v4161_v27 }
 0x1a3   :  { %2965 = vmatprep.subr.mxu1 %v3425_v2  ;;  %1333 = vmatprep.subr.mxu0 %v4165_v28 }
 0x1a4   :  { %2966 = vmatpush3.msra.mxu1 %v4290_v60  ;;  %1334 = vmatpush1.msra.mxu0 %v4169_v29 }
 0x1a5   :  { %2967 = vmatprep.subr.mxu1 %v3425_v2  ;;  %1335 = vmatprep.subr.mxu0 %v4173_v30 }
 0x1a6   :  { %2968 = vmatpush3.msra.mxu1 %v4296_v61  ;;  %1336 = vmatpush1.msra.mxu0 %v4177_v31 }
 0x1a7   :  { %2969 = vmatprep.subr.mxu1 %v3425_v2  ;;  %1337 = vmatprep.subr.mxu0 %v4181_v32 }
 0x1a8   :  { %2970 = vmatpush3.msra.mxu1 %v4302_v63  ;;  %1338 = vmatpush1.msra.mxu0 %v4185_v33  ;;  %v4392_v49 = vpop.f32.mrf.mxu0 }
 0x1a9   :  { %2971 = vmatprep.subr.mxu1 %v3425_v2  ;;  %1339 = vmatprep.subr.mxu0 %v4189_v34 }
 0x1aa   :  { %2972 = vmatpush3.msra.mxu1 %v4308_v0  ;;  %1340 = vmatpush1.msra.mxu0 %v4193_v35  ;;  %v487_v54 = vpop.f32.mrf.mxu0 }
 0x1ab   :  { %2973 = vmatprep.subr.mxu1 %v3425_v2  ;;  %1341 = vmatprep.subr.mxu0 %v4197_v36  ;;  %v710_v62 = vadd.f32 %v487_v54, %v4288_v59 }
 0x1ac   :  { %2974 = vmatpush3.msra.mxu1 %v4315_v8  ;;  %1342 = vmatpush1.msra.mxu0 %v4201_v37 }
 0x1ad   :  { %2975 = vmatprep.subr.mxu1 %v3425_v2  ;;  %1343 = vmatprep.subr.mxu0 %v4205_v38 }
 0x1ae   :  { %v556_v9 = vpop.f32.mrf.mxu1  ;;  %2976 = vmatpush3.msra.mxu1 %v4323_v39  ;;  %1344 = vmatpush1.msra.mxu0 %v4209_v42 }
 0x1af   :  { %v4321_v15 = vadd.f32 %v560_v1, %v556_v9  ;;  %2977 = vmatprep.subr.mxu1 %v3425_v2  ;;  %1345 = vmatprep.subr.mxu0 %v4216_v45 }
 0x1b0   :  { %v2781_v40 = vpop.f32.mrf.mxu1  ;;  %2978 = vmatpush3.msra.mxu1 %v4331_v4  ;;  %1346 = vmatpush1.msra.mxu0 %v4220_v48 }
 0x1b1   :  { %v562_v3 = vmax.f32 %v4213_v43, %v4321_v15  ;;  %2979 = vmatprep.subr.mxu1 %v3425_v2  ;;  %1347 = vmatprep.subr.mxu0 %v4224_v50  ;;  %v3440_v43 = vmov 14  }
 0x1b2   :  { %2980 = vmatpush3.msra.mxu1 %v4337_v6  ;;  %1348 = vmatpush1.msra.mxu0 %v4228_v51 }
 0x1b3   :  { %2981 = vmatprep.subr.mxu1 %v3425_v2  ;;  %1349 = vmatprep.subr.mxu0 %v4232_v52 }
 0x1b4   :  { %2982 = vmatpush3.msra.mxu1 %v4344_v7  ;;  %1350 = vmatpush1.msra.mxu0 %v4237_v53 }
 0x1b5   :  { %1383 = vmatprep.mubr.f32.mxu0 %v3425_v2  ;;  %2983 = vmatprep.subr.mxu1 %v3425_v2 }
 0x1b6   :  { %2436 = vmatmul.mubr.msk.f32.vlgmr.msra.gmra.mxu0 %vm1316_vm10, %v3433_v46  ;;  %2984 = vmatpush3.msra.mxu1 %v4353_v10 }
 0x1b7   :  { %1469 = vmatprep.subr.mxu0 %v4102_v11  ;;  %2985 = vmatprep.subr.mxu1 %v3425_v2 }
 0x1b8   :  { %1470 = vmatpush1.msra.mxu0 %v4106_v12  ;;  %3277 = vset.pattern.permute.xlu1 %v3439_v13 }
 0x1b9   :  { %2986 = vmatpush3.msra.mxu1 %v4359_v41  ;;  %1471 = vmatprep.subr.mxu0 %v4110_v14 }
 0x1ba   :  { %1914 = vperm.xlu1 %3277, %v4113_v16   ;;  %2987 = vmatprep.subr.mxu1 %v3425_v2 }
 0x1bb   :  { %1472 = vmatpush1.msra.mxu0 %v4117_v17  ;;  %2988 = vmatpush3.msra.mxu1 %v4366_v47 }
 0x1bc   :  { %2989 = vmatprep.mubr.msk.f32.mxu1 %vm3434_vm3, %v3425_v2  ;;  %1473 = vmatprep.subr.mxu0 %v4123_v18 }
 0x1bd   :  { %2990 = vmatmul.mubr.msk.f32.vlgmr.msra.gmra.mxu1 %vm1316_vm10, %v3433_v46  ;;  %1474 = vmatpush1.msra.mxu0 %v4129_v19 }
 0x1be   :  { %2992 = vmatprep.subr.mxu1 %v3425_v2  ;;  %1475 = vmatprep.subr.mxu0 %v4133_v20 }
 0x1bf   :  { %2993 = vmatpush3.msra.mxu1 %v4264_v55  ;;  %1476 = vmatpush1.msra.mxu0 %v4137_v21 }
 0x1c0   :  { %2994 = vmatprep.subr.mxu1 %v3425_v2  ;;  %1477 = vmatprep.subr.mxu0 %v4141_v22 }
 0x1c1   :  { %2995 = vmatpush3.msra.mxu1 %v4270_v56  ;;  %1478 = vmatpush1.msra.mxu0 %v4145_v23 }
 0x1c2   :  { %2996 = vmatprep.subr.mxu1 %v3425_v2  ;;  %1479 = vmatprep.subr.mxu0 %v4149_v24 }
 0x1c3   :  { %2997 = vmatpush3.msra.mxu1 %v4276_v57  ;;  %1480 = vmatpush1.msra.mxu0 %v4153_v25 }
 0x1c4   :  { %2998 = vmatprep.subr.mxu1 %v3425_v2  ;;  %1481 = vmatprep.subr.mxu0 %v4157_v26 }
 0x1c5   :  { %2999 = vmatpush3.msra.mxu1 %v4282_v58  ;;  %1482 = vmatpush1.msra.mxu0 %v4161_v27 }
 0x1c6   :  { %3000 = vmatprep.subr.mxu1 %v3425_v2  ;;  %1483 = vmatprep.subr.mxu0 %v4165_v28 }
 0x1c7   :  { %3001 = vmatpush3.msra.mxu1 %v4290_v60  ;;  %1484 = vmatpush1.msra.mxu0 %v4169_v29 }
 0x1c8   :  { %3002 = vmatprep.subr.mxu1 %v3425_v2  ;;  %1485 = vmatprep.subr.mxu0 %v4173_v30 }
 0x1c9   :  { %3003 = vmatpush3.msra.mxu1 %v4296_v61  ;;  %1486 = vmatpush1.msra.mxu0 %v4177_v31 }
 0x1ca   :  { %3004 = vmatprep.subr.mxu1 %v3425_v2  ;;  %1487 = vmatprep.subr.mxu0 %v4181_v32  ;;  %v4475_v15 = vpop.f32.mrf.mxu0 }
 0x1cb   :  { %3005 = vmatpush3.msra.mxu1 %v4302_v63  ;;  %1488 = vmatpush1.msra.mxu0 %v4185_v33 }
 0x1cc   :  { %3006 = vmatprep.subr.mxu1 %v3425_v2  ;;  %1489 = vmatprep.subr.mxu0 %v4189_v34 }
 0x1cd   :  { %3007 = vmatpush3.msra.mxu1 %v4308_v0  ;;  %1490 = vmatpush1.msra.mxu0 %v4193_v35 }
 0x1ce   :  { %3008 = vmatprep.subr.mxu1 %v3425_v2  ;;  %1491 = vmatprep.subr.mxu0 %v4197_v36 }
 0x1cf   :  { %3009 = vmatpush3.msra.mxu1 %v4315_v8  ;;  %1492 = vmatpush1.msra.mxu0 %v4201_v37 }
 0x1d0   :  { %v706_v1 = vpop.f32.mrf.mxu1  ;;  %3010 = vmatprep.subr.mxu1 %v3425_v2  ;;  %1493 = vmatprep.subr.mxu0 %v4205_v38 }
 0x1d1   :  { %v711_v9 = vadd.f32 %v710_v62, %v706_v1  ;;  %3011 = vmatpush3.msra.mxu1 %v4323_v39  ;;  %1494 = vmatpush1.msra.mxu0 %v4209_v42 }
 0x1d2   :  { %v2816_v40 = vpop.f32.mrf.mxu1  ;;  %3012 = vmatprep.subr.mxu1 %v3425_v2  ;;  %1495 = vmatprep.subr.mxu0 %v4216_v45 }
 0x1d3   :  { %v4422_v59 = vmax.f32 %v562_v3, %v711_v9  ;;  %3013 = vmatpush3.msra.mxu1 %v4331_v4  ;;  %1496 = vmatpush1.msra.mxu0 %v4220_v48  ;;  %v637_v3 = vpop.f32.mrf.mxu0  ;;  %v3441_v40 = vmov 15  }
 0x1d4   :  { %3014 = vmatprep.subr.mxu1 %v3425_v2  ;;  %1497 = vmatprep.subr.mxu0 %v4224_v50  ;;  %v860_v13 = vadd.f32 %v637_v3, %v4392_v49 }
 0x1d5   :  { %3015 = vmatpush3.msra.mxu1 %v4337_v6  ;;  %1498 = vmatpush1.msra.mxu0 %v4228_v51 }
 0x1d6   :  { %3016 = vmatprep.subr.mxu1 %v3425_v2  ;;  %1499 = vmatprep.subr.mxu0 %v4232_v52 }
 0x1d7   :  { %3017 = vmatpush3.msra.mxu1 %v4344_v7  ;;  %1500 = vmatpush1.msra.mxu0 %v4237_v53 }
 0x1d8   :  { %1533 = vmatprep.mubr.f32.mxu0 %v3425_v2  ;;  %3018 = vmatprep.subr.mxu1 %v3425_v2 }
 0x1d9   :  { %2439 = vmatmul.mubr.msk.f32.vlgmr.msra.gmra.mxu0 %vm1466_vm11, %v3433_v46  ;;  %3019 = vmatpush3.msra.mxu1 %v4353_v10 }
 0x1da   :  { %1619 = vmatprep.subr.mxu0 %v4102_v11  ;;  %3020 = vmatprep.subr.mxu1 %v3425_v2 }
 0x1db   :  { %1620 = vmatpush1.msra.mxu0 %v4106_v12  ;;  %3278 = vset.pattern.permute.xlu0 %v3440_v43 }
 0x1dc   :  { %3021 = vmatpush3.msra.mxu1 %v4359_v41  ;;  %1621 = vmatprep.subr.mxu0 %v4110_v14 }
 0x1dd   :  { %2064 = vperm.xlu0 %3278, %v4113_v16   ;;  %3022 = vmatprep.subr.mxu1 %v3425_v2 }
 0x1de   :  { %1622 = vmatpush1.msra.mxu0 %v4117_v17  ;;  %3023 = vmatpush3.msra.mxu1 %v4366_v47 }
 0x1df   :  { %3024 = vmatprep.mubr.msk.f32.mxu1 %vm3434_vm3, %v3425_v2  ;;  %1623 = vmatprep.subr.mxu0 %v4123_v18 }
 0x1e0   :  { %3025 = vmatmul.mubr.msk.f32.vlgmr.msra.gmra.mxu1 %vm1466_vm11, %v3433_v46  ;;  %1624 = vmatpush1.msra.mxu0 %v4129_v19 }
 0x1e1   :  { %3027 = vmatprep.subr.mxu1 %v3425_v2  ;;  %1625 = vmatprep.subr.mxu0 %v4133_v20 }
 0x1e2   :  { %3028 = vmatpush3.msra.mxu1 %v4264_v55  ;;  %1626 = vmatpush1.msra.mxu0 %v4137_v21 }
 0x1e3   :  { %3029 = vmatprep.subr.mxu1 %v3425_v2  ;;  %1627 = vmatprep.subr.mxu0 %v4141_v22 }
 0x1e4   :  { %3030 = vmatpush3.msra.mxu1 %v4270_v56  ;;  %1628 = vmatpush1.msra.mxu0 %v4145_v23 }
 0x1e5   :  { %3031 = vmatprep.subr.mxu1 %v3425_v2  ;;  %1629 = vmatprep.subr.mxu0 %v4149_v24 }
 0x1e6   :  { %3032 = vmatpush3.msra.mxu1 %v4276_v57  ;;  %1630 = vmatpush1.msra.mxu0 %v4153_v25 }
 0x1e7   :  { %3033 = vmatprep.subr.mxu1 %v3425_v2  ;;  %1631 = vmatprep.subr.mxu0 %v4157_v26 }
 0x1e8   :  { %3034 = vmatpush3.msra.mxu1 %v4282_v58  ;;  %1632 = vmatpush1.msra.mxu0 %v4161_v27 }
 0x1e9   :  { %3035 = vmatprep.subr.mxu1 %v3425_v2  ;;  %1633 = vmatprep.subr.mxu0 %v4165_v28 }
 0x1ea   :  { %3036 = vmatpush3.msra.mxu1 %v4290_v60  ;;  %1634 = vmatpush1.msra.mxu0 %v4169_v29 }
 0x1eb   :  { %3037 = vmatprep.subr.mxu1 %v3425_v2  ;;  %1635 = vmatprep.subr.mxu0 %v4173_v30 }
 0x1ec   :  { %3038 = vmatpush3.msra.mxu1 %v4296_v61  ;;  %1636 = vmatpush1.msra.mxu0 %v4177_v31 }
 0x1ed   :  { %3039 = vmatprep.subr.mxu1 %v3425_v2  ;;  %1637 = vmatprep.subr.mxu0 %v4181_v32 }
 0x1ee   :  { %3040 = vmatpush3.msra.mxu1 %v4302_v63  ;;  %1638 = vmatpush1.msra.mxu0 %v4185_v33 }
 0x1ef   :  { %3041 = vmatprep.subr.mxu1 %v3425_v2  ;;  %1639 = vmatprep.subr.mxu0 %v4189_v34  ;;  %v1615_v9 = vpop.permute.xlu0 %1614 }
 0x1f0   :  { %3042 = vmatpush3.msra.mxu1 %v4308_v0  ;;  %1640 = vmatpush1.msra.mxu0 %v4193_v35  ;;  %vm1616_vm12 = vcmp.eq.s32.totalorder %v3625_v44, %v1615_v9 }
 0x1f1   :  { %3043 = vmatprep.subr.mxu1 %v3425_v2  ;;  %1641 = vmatprep.subr.mxu0 %v4197_v36 }
 0x1f2   :  { %v856_v54 = vpop.f32.mrf.mxu1  ;;  %3044 = vmatpush3.msra.mxu1 %v4315_v8  ;;  %1642 = vmatpush1.msra.mxu0 %v4201_v37 }
 0x1f3   :  { %v4498_v62 = vadd.f32 %v860_v13, %v856_v54  ;;  %3045 = vmatprep.subr.mxu1 %v3425_v2  ;;  %1643 = vmatprep.subr.mxu0 %v4205_v38 }
 0x1f4   :  { %v2851_v49 = vpop.f32.mrf.mxu1  ;;  %3046 = vmatpush3.msra.mxu1 %v4323_v39  ;;  %1644 = vmatpush1.msra.mxu0 %v4209_v42 }
 0x1f5   :  { %v862_v1 = vmax.f32 %v4422_v59, %v4498_v62  ;;  %3047 = vmatprep.subr.mxu1 %v3425_v2  ;;  %1645 = vmatprep.subr.mxu0 %v4216_v45 }
 0x1f6   :  { %3048 = vmatpush3.msra.mxu1 %v4331_v4  ;;  %1646 = vmatpush1.msra.mxu0 %v4220_v48 }
 0x1f7   :  { %3049 = vmatprep.subr.mxu1 %v3425_v2  ;;  %1647 = vmatprep.subr.mxu0 %v4224_v50 }
 0x1f8   :  { %3050 = vmatpush3.msra.mxu1 %v4337_v6  ;;  %1648 = vmatpush1.msra.mxu0 %v4228_v51 }
 0x1f9   :  { %3051 = vmatprep.subr.mxu1 %v3425_v2  ;;  %1649 = vmatprep.subr.mxu0 %v4232_v52 }
 0x1fa   :  { %3052 = vmatpush3.msra.mxu1 %v4344_v7  ;;  %1650 = vmatpush1.msra.mxu0 %v4237_v53 }
 0x1fb   :  { %1683 = vmatprep.mubr.f32.mxu0 %v3425_v2  ;;  %3053 = vmatprep.subr.mxu1 %v3425_v2 }
 0x1fc   :  { %2442 = vmatmul.mubr.msk.f32.vlgmr.msra.gmra.mxu0 %vm1616_vm12, %v3433_v46  ;;  %3054 = vmatpush3.msra.mxu1 %v4353_v10 }
 0x1fd   :  { %1769 = vmatprep.subr.mxu0 %v4102_v11  ;;  %3055 = vmatprep.subr.mxu1 %v3425_v2 }
 0x1fe   :  { %1770 = vmatpush1.msra.mxu0 %v4106_v12  ;;  %3279 = vset.pattern.permute.xlu1 %v3441_v40 }
 0x1ff   :  { %3056 = vmatpush3.msra.mxu1 %v4359_v41  ;;  %1771 = vmatprep.subr.mxu0 %v4110_v14 }
 0x200   :  { %2213 = vperm.xlu1 %3279, %v4113_v16   ;;  %3057 = vmatprep.subr.mxu1 %v3425_v2  ;;  %v4558_v16 = vpop.f32.mrf.mxu0 }
 0x201   :  { %1772 = vmatpush1.msra.mxu0 %v4117_v17  ;;  %3058 = vmatpush3.msra.mxu1 %v4366_v47 }
 0x202   :  { %3059 = vmatprep.mubr.msk.f32.mxu1 %vm3434_vm3, %v3425_v2  ;;  %1773 = vmatprep.subr.mxu0 %v4123_v18  ;;  %v787_v5 = vpop.f32.mrf.mxu0 }
 0x203   :  { %3060 = vmatmul.mubr.msk.f32.vlgmr.msra.gmra.mxu1 %vm1616_vm12, %v3433_v46  ;;  %1774 = vmatpush1.msra.mxu0 %v4129_v19  ;;  %v1010_v43 = vadd.f32 %v787_v5, %v4475_v15 }
 0x204   :  { %3062 = vmatprep.subr.mxu1 %v3425_v2  ;;  %1775 = vmatprep.subr.mxu0 %v4133_v20 }
 0x205   :  { %3063 = vmatpush3.msra.mxu1 %v4264_v55  ;;  %1776 = vmatpush1.msra.mxu0 %v4137_v21 }
 0x206   :  { %3064 = vmatprep.subr.mxu1 %v3425_v2  ;;  %1777 = vmatprep.subr.mxu0 %v4141_v22 }
 0x207   :  { %3065 = vmatpush3.msra.mxu1 %v4270_v56  ;;  %1778 = vmatpush1.msra.mxu0 %v4145_v23 }
 0x208   :  { %3066 = vmatprep.subr.mxu1 %v3425_v2  ;;  %1779 = vmatprep.subr.mxu0 %v4149_v24 }
 0x209   :  { %3067 = vmatpush3.msra.mxu1 %v4276_v57  ;;  %1780 = vmatpush1.msra.mxu0 %v4153_v25 }
 0x20a   :  { %3068 = vmatprep.subr.mxu1 %v3425_v2  ;;  %1781 = vmatprep.subr.mxu0 %v4157_v26 }
 0x20b   :  { %3069 = vmatpush3.msra.mxu1 %v4282_v58  ;;  %1782 = vmatpush1.msra.mxu0 %v4161_v27 }
 0x20c   :  { %3070 = vmatprep.subr.mxu1 %v3425_v2  ;;  %1783 = vmatprep.subr.mxu0 %v4165_v28 }
 0x20d   :  { %3071 = vmatpush3.msra.mxu1 %v4290_v60  ;;  %1784 = vmatpush1.msra.mxu0 %v4169_v29 }
 0x20e   :  { %3072 = vmatprep.subr.mxu1 %v3425_v2  ;;  %1785 = vmatprep.subr.mxu0 %v4173_v30  ;;  %v4642_v59 = vpop.f32.mrf.mxu0 }
 0x20f   :  { %3073 = vmatpush3.msra.mxu1 %v4296_v61  ;;  %1786 = vmatpush1.msra.mxu0 %v4177_v31 }
 0x210   :  { %3074 = vmatprep.subr.mxu1 %v3425_v2  ;;  %1787 = vmatprep.subr.mxu0 %v4181_v32  ;;  %v937_v62 = vpop.f32.mrf.mxu0 }
 0x211   :  { %3075 = vmatpush3.msra.mxu1 %v4302_v63  ;;  %1788 = vmatpush1.msra.mxu0 %v4185_v33 }
 0x212   :  { %3076 = vmatprep.subr.mxu1 %v3425_v2  ;;  %1789 = vmatprep.subr.mxu0 %v4189_v34  ;;  %v1765_v49 = vpop.permute.xlu1 %1764 }
 0x213   :  { %3077 = vmatpush3.msra.mxu1 %v4308_v0  ;;  %1790 = vmatpush1.msra.mxu0 %v4193_v35  ;;  %vm1766_vm13 = vcmp.eq.s32.totalorder %v3625_v44, %v1765_v49 }
 0x214   :  { %3078 = vmatprep.subr.mxu1 %v3425_v2  ;;  %1791 = vmatprep.subr.mxu0 %v4197_v36  ;;  %v1006_v3 = vpop.f32.mrf.mxu1 }
 0x215   :  { %3079 = vmatpush3.msra.mxu1 %v4315_v8  ;;  %1792 = vmatpush1.msra.mxu0 %v4201_v37  ;;  %v1011_v13 = vadd.f32 %v1010_v43, %v1006_v3 }
 0x216   :  { %3080 = vmatprep.subr.mxu1 %v3425_v2  ;;  %1793 = vmatprep.subr.mxu0 %v4205_v38  ;;  %v2886_v54 = vpop.f32.mrf.mxu1 }
 0x217   :  { %3081 = vmatpush3.msra.mxu1 %v4323_v39  ;;  %1794 = vmatpush1.msra.mxu0 %v4209_v42  ;;  %v4588_v15 = vmax.f32 %v862_v1, %v1011_v13  ;;  %v1160_v1 = vadd.f32 %v937_v62, %v4558_v16 }
 0x218   :  { %3082 = vmatprep.subr.mxu1 %v3425_v2  ;;  %1795 = vmatprep.subr.mxu0 %v4216_v45 }
 0x219   :  { %3083 = vmatpush3.msra.mxu1 %v4331_v4  ;;  %1796 = vmatpush1.msra.mxu0 %v4220_v48 }
 0x21a   :  { %3084 = vmatprep.subr.mxu1 %v3425_v2  ;;  %1797 = vmatprep.subr.mxu0 %v4224_v50 }
 0x21b   :  { %3085 = vmatpush3.msra.mxu1 %v4337_v6  ;;  %1798 = vmatpush1.msra.mxu0 %v4228_v51 }
 0x21c   :  { %3086 = vmatprep.subr.mxu1 %v3425_v2  ;;  %1799 = vmatprep.subr.mxu0 %v4232_v52 }
 0x21d   :  { %3087 = vmatpush3.msra.mxu1 %v4344_v7  ;;  %1800 = vmatpush1.msra.mxu0 %v4237_v53 }
 0x21e   :  { %1833 = vmatprep.mubr.f32.mxu0 %v3425_v2  ;;  %3088 = vmatprep.subr.mxu1 %v3425_v2 }
 0x21f   :  { %2445 = vmatmul.mubr.msk.f32.vlgmr.msra.gmra.mxu0 %vm1766_vm13, %v3433_v46  ;;  %3089 = vmatpush3.msra.mxu1 %v4353_v10 }
 0x220   :  { %1919 = vmatprep.subr.mxu0 %v4102_v11  ;;  %3090 = vmatprep.subr.mxu1 %v3425_v2 }
 0x221   :  { %1920 = vmatpush1.msra.mxu0 %v4106_v12  ;;  %3091 = vmatpush3.msra.mxu1 %v4359_v41 }
 0x222   :  { %1921 = vmatprep.subr.mxu0 %v4110_v14  ;;  %3092 = vmatprep.subr.mxu1 %v3425_v2 }
 0x223   :  { %1922 = vmatpush1.msra.mxu0 %v4117_v17  ;;  %3093 = vmatpush3.msra.mxu1 %v4366_v47 }
 0x224   :  { %3094 = vmatprep.mubr.msk.f32.mxu1 %vm3434_vm3, %v3425_v2  ;;  %1923 = vmatprep.subr.mxu0 %v4123_v18 }
 0x225   :  { %3095 = vmatmul.mubr.msk.f32.vlgmr.msra.gmra.mxu1 %vm1766_vm13, %v3433_v46  ;;  %1924 = vmatpush1.msra.mxu0 %v4129_v19 }
 0x226   :  { %3097 = vmatprep.subr.mxu1 %v3425_v2  ;;  %1925 = vmatprep.subr.mxu0 %v4133_v20 }
 0x227   :  { %3098 = vmatpush3.msra.mxu1 %v4264_v55  ;;  %1926 = vmatpush1.msra.mxu0 %v4137_v21 }
 0x228   :  { %3099 = vmatprep.subr.mxu1 %v3425_v2  ;;  %1927 = vmatprep.subr.mxu0 %v4141_v22 }
 0x229   :  { %3100 = vmatpush3.msra.mxu1 %v4270_v56  ;;  %1928 = vmatpush1.msra.mxu0 %v4145_v23 }
 0x22a   :  { %3101 = vmatprep.subr.mxu1 %v3425_v2  ;;  %1929 = vmatprep.subr.mxu0 %v4149_v24 }
 0x22b   :  { %3102 = vmatpush3.msra.mxu1 %v4276_v57  ;;  %1930 = vmatpush1.msra.mxu0 %v4153_v25 }
 0x22c   :  { %3103 = vmatprep.subr.mxu1 %v3425_v2  ;;  %1931 = vmatprep.subr.mxu0 %v4157_v26 }
 0x22d   :  { %3104 = vmatpush3.msra.mxu1 %v4282_v58  ;;  %1932 = vmatpush1.msra.mxu0 %v4161_v27 }
 0x22e   :  { %3105 = vmatprep.subr.mxu1 %v3425_v2  ;;  %1933 = vmatprep.subr.mxu0 %v4165_v28 }
 0x22f   :  { %3106 = vmatpush3.msra.mxu1 %v4290_v60  ;;  %1934 = vmatpush1.msra.mxu0 %v4169_v29 }
 0x230   :  { %3107 = vmatprep.subr.mxu1 %v3425_v2  ;;  %1935 = vmatprep.subr.mxu0 %v4173_v30 }
 0x231   :  { %3108 = vmatpush3.msra.mxu1 %v4296_v61  ;;  %1936 = vmatpush1.msra.mxu0 %v4177_v31 }
 0x232   :  { %3109 = vmatprep.subr.mxu1 %v3425_v2  ;;  %1937 = vmatprep.subr.mxu0 %v4181_v32 }
 0x233   :  { %3110 = vmatpush3.msra.mxu1 %v4302_v63  ;;  %1938 = vmatpush1.msra.mxu0 %v4185_v33 }
 0x234   :  { %3111 = vmatprep.subr.mxu1 %v3425_v2  ;;  %1939 = vmatprep.subr.mxu0 %v4189_v34 }
 0x235   :  { %3112 = vmatpush3.msra.mxu1 %v4308_v0  ;;  %1940 = vmatpush1.msra.mxu0 %v4193_v35  ;;  %v1915_v3 = vpop.permute.xlu1 %1914 }
 0x236   :  { %3113 = vmatprep.subr.mxu1 %v3425_v2  ;;  %1941 = vmatprep.subr.mxu0 %v4197_v36  ;;  %vm1916_vm14 = vcmp.eq.s32.totalorder %v3625_v44, %v1915_v3 }
 0x237   :  { %3114 = vmatpush3.msra.mxu1 %v4315_v8  ;;  %1942 = vmatpush1.msra.mxu0 %v4201_v37  ;;  %v1156_v9 = vpop.f32.mrf.mxu1 }
 0x238   :  { %3115 = vmatprep.subr.mxu1 %v3425_v2  ;;  %1943 = vmatprep.subr.mxu0 %v4205_v38  ;;  %v4665_v5 = vadd.f32 %v1160_v1, %v1156_v9 }
 0x239   :  { %3116 = vmatpush3.msra.mxu1 %v4323_v39  ;;  %1944 = vmatpush1.msra.mxu0 %v4209_v42  ;;  %v2921_v16 = vpop.f32.mrf.mxu1 }
 0x23a   :  { %3117 = vmatprep.subr.mxu1 %v3425_v2  ;;  %1945 = vmatprep.subr.mxu0 %v4216_v45  ;;  %v1162_v43 = vmax.f32 %v4588_v15, %v4665_v5 }
 0x23b   :  { %3118 = vmatpush3.msra.mxu1 %v4331_v4  ;;  %1946 = vmatpush1.msra.mxu0 %v4220_v48 }
 0x23c   :  { %3119 = vmatprep.subr.mxu1 %v3425_v2  ;;  %1947 = vmatprep.subr.mxu0 %v4224_v50 }
 0x23d   :  { %3120 = vmatpush3.msra.mxu1 %v4337_v6  ;;  %1948 = vmatpush1.msra.mxu0 %v4228_v51 }
 0x23e   :  { %3121 = vmatprep.subr.mxu1 %v3425_v2  ;;  %1949 = vmatprep.subr.mxu0 %v4232_v52 }
 0x23f   :  { %3122 = vmatpush3.msra.mxu1 %v4344_v7  ;;  %1950 = vmatpush1.msra.mxu0 %v4237_v53 }
 0x240   :  { %1983 = vmatprep.mubr.f32.mxu0 %v3425_v2  ;;  %3123 = vmatprep.subr.mxu1 %v3425_v2 }
 0x241   :  { %2448 = vmatmul.mubr.msk.f32.vlgmr.msra.gmra.mxu0 %vm1916_vm14, %v3433_v46  ;;  %3124 = vmatpush3.msra.mxu1 %v4353_v10 }
 0x242   :  { %2069 = vmatprep.subr.mxu0 %v4102_v11  ;;  %3125 = vmatprep.subr.mxu1 %v3425_v2  ;;  %v4725_v11 = vpop.f32.mrf.mxu0 }
 0x243   :  { %2070 = vmatpush1.msra.mxu0 %v4106_v12  ;;  %3126 = vmatpush3.msra.mxu1 %v4359_v41 }
 0x244   :  { %2071 = vmatprep.subr.mxu0 %v4110_v14  ;;  %3127 = vmatprep.subr.mxu1 %v3425_v2  ;;  %v1087_v12 = vpop.f32.mrf.mxu0 }
 0x245   :  { %2072 = vmatpush1.msra.mxu0 %v4117_v17  ;;  %3128 = vmatpush3.msra.mxu1 %v4366_v47  ;;  %v1310_v14 = vadd.f32 %v1087_v12, %v4642_v59 }
 0x246   :  { %3129 = vmatprep.mubr.msk.f32.mxu1 %vm3434_vm3, %v3425_v2  ;;  %2073 = vmatprep.subr.mxu0 %v4123_v18 }
 0x247   :  { %3130 = vmatmul.mubr.msk.f32.vlgmr.msra.gmra.mxu1 %vm1916_vm14, %v3433_v46  ;;  %2074 = vmatpush1.msra.mxu0 %v4129_v19 }
 0x248   :  { %3132 = vmatprep.subr.mxu1 %v3425_v2  ;;  %2075 = vmatprep.subr.mxu0 %v4133_v20 }
 0x249   :  { %3133 = vmatpush3.msra.mxu1 %v4264_v55  ;;  %2076 = vmatpush1.msra.mxu0 %v4137_v21 }
 0x24a   :  { %3134 = vmatprep.subr.mxu1 %v3425_v2  ;;  %2077 = vmatprep.subr.mxu0 %v4141_v22 }
 0x24b   :  { %3135 = vmatpush3.msra.mxu1 %v4270_v56  ;;  %2078 = vmatpush1.msra.mxu0 %v4145_v23 }
 0x24c   :  { %3136 = vmatprep.subr.mxu1 %v3425_v2  ;;  %2079 = vmatprep.subr.mxu0 %v4149_v24 }
 0x24d   :  { %3137 = vmatpush3.msra.mxu1 %v4276_v57  ;;  %2080 = vmatpush1.msra.mxu0 %v4153_v25 }
 0x24e   :  { %3138 = vmatprep.subr.mxu1 %v3425_v2  ;;  %2081 = vmatprep.subr.mxu0 %v4157_v26 }
 0x24f   :  { %3139 = vmatpush3.msra.mxu1 %v4282_v58  ;;  %2082 = vmatpush1.msra.mxu0 %v4161_v27 }
 0x250   :  { %3140 = vmatprep.subr.mxu1 %v3425_v2  ;;  %2083 = vmatprep.subr.mxu0 %v4165_v28 }
 0x251   :  { %3141 = vmatpush3.msra.mxu1 %v4290_v60  ;;  %2084 = vmatpush1.msra.mxu0 %v4169_v29 }
 0x252   :  { %3142 = vmatprep.subr.mxu1 %v3425_v2  ;;  %2085 = vmatprep.subr.mxu0 %v4173_v30 }
 0x253   :  { %3143 = vmatpush3.msra.mxu1 %v4296_v61  ;;  %2086 = vmatpush1.msra.mxu0 %v4177_v31  ;;  %v1235_v22 = vpop.f32.mrf.mxu0 }
 0x254   :  { %3144 = vmatprep.subr.mxu1 %v3425_v2  ;;  %2087 = vmatprep.subr.mxu0 %v4181_v32 }
 0x255   :  { %3145 = vmatpush3.msra.mxu1 %v4302_v63  ;;  %2088 = vmatpush1.msra.mxu0 %v4185_v33  ;;  %v1237_v23 = vpop.f32.mrf.mxu0 }
 0x256   :  { %3146 = vmatprep.subr.mxu1 %v3425_v2  ;;  %2089 = vmatprep.subr.mxu0 %v4189_v34  ;;  %v1460_v24 = vadd.f32 %v1237_v23, %v4725_v11 }
 0x257   :  { %3147 = vmatpush3.msra.mxu1 %v4308_v0  ;;  %2090 = vmatpush1.msra.mxu0 %v4193_v35 }
 0x258   :  { %3148 = vmatprep.subr.mxu1 %v3425_v2  ;;  %2091 = vmatprep.subr.mxu0 %v4197_v36  ;;  %v2065_v20 = vpop.permute.xlu0 %2064 }
 0x259   :  { %3149 = vmatpush3.msra.mxu1 %v4315_v8  ;;  %2092 = vmatpush1.msra.mxu0 %v4201_v37  ;;  %vm2066_vm15 = vcmp.eq.s32.totalorder %v3625_v44, %v2065_v20  ;;  %v2315_v37 = vld [vmem:[#allocation7 + $0x78] sm:$0xff] }
 0x25a   :  { %3150 = vmatprep.subr.mxu1 %v3425_v2  ;;  %2093 = vmatprep.subr.mxu0 %v4205_v38  ;;  %v1306_v17 = vpop.f32.mrf.mxu1  ;;  %v2314_v38 = vld [vmem:[#allocation7 + $0x70] sm:$0xff] }
 0x25b   :  { %3151 = vmatpush3.msra.mxu1 %v4323_v39  ;;  %2094 = vmatpush1.msra.mxu0 %v4209_v42  ;;  %v1311_v18 = vadd.f32 %v1310_v14, %v1306_v17  ;;  %v2313_v42 = vld [vmem:[#allocation7 + $0x68] sm:$0xff] }
 0x25c   :  { %3152 = vmatprep.subr.mxu1 %v3425_v2  ;;  %2095 = vmatprep.subr.mxu0 %v4216_v45  ;;  %v2956_v19 = vpop.f32.mrf.mxu1  ;;  %v2310_v45 = vld [vmem:[#allocation7 + $0x50] sm:$0xff] }
 0x25d   :  { %3153 = vmatpush3.msra.mxu1 %v4331_v4  ;;  %2096 = vmatpush1.msra.mxu0 %v4220_v48  ;;  %v4755_v21 = vmax.f32 %v1162_v43, %v1311_v18  ;;  %v2309_v48 = vld [vmem:[#allocation7 + $0x48] sm:$0xff] }
 0x25e   :  { %3154 = vmatprep.subr.mxu1 %v3425_v2  ;;  %2097 = vmatprep.subr.mxu0 %v4224_v50  ;;  %v2308_v50 = vld [vmem:[#allocation7 + $0x40] sm:$0xff] }
 0x25f   :  { %3155 = vmatpush3.msra.mxu1 %v4337_v6  ;;  %2098 = vmatpush1.msra.mxu0 %v4228_v51  ;;  %v2307_v51 = vld [vmem:[#allocation7 + $0x38] sm:$0xff] }
 0x260   :  { %3156 = vmatprep.subr.mxu1 %v3425_v2  ;;  %2099 = vmatprep.subr.mxu0 %v4232_v52 }
 0x261   :  { %3157 = vmatpush3.msra.mxu1 %v4344_v7  ;;  %2100 = vmatpush1.msra.mxu0 %v4237_v53  ;;  %v2306_v53 = vld [vmem:[#allocation7 + $0x30] sm:$0xff] }
 0x262   :  { %2133 = vmatprep.mubr.f32.mxu0 %v3425_v2  ;;  %3158 = vmatprep.subr.mxu1 %v3425_v2 }
 0x263   :  { %2451 = vmatmul.mubr.msk.f32.vlgmr.msra.gmra.mxu0 %vm2066_vm15, %v3433_v46  ;;  %3159 = vmatpush3.msra.mxu1 %v4353_v10 }
 0x264   :  { %3167 = vmatprep.subr.mxu0 %v3425_v2  ;;  %3160 = vmatprep.subr.mxu1 %v3425_v2 }
 0x265   :  { %3168 = vmatpush3.msra.mxu0 %v4264_v55  ;;  %3161 = vmatpush3.msra.mxu1 %v4359_v41  ;;  %v2305_v55 = vld [vmem:[#allocation7 + $0x28] sm:$0xff] }
 0x266   :  { %3169 = vmatprep.subr.mxu0 %v3425_v2  ;;  %3162 = vmatprep.subr.mxu1 %v3425_v2 }
 0x267   :  { %3170 = vmatpush3.msra.mxu0 %v4270_v56  ;;  %3163 = vmatpush3.msra.mxu1 %v4366_v47 }
 0x268   :  { %3164 = vmatprep.mubr.msk.f32.mxu1 %vm3434_vm3, %v3425_v2  ;;  %3171 = vmatprep.subr.mxu0 %v3425_v2 }
 0x269   :  { %3165 = vmatmul.mubr.msk.f32.vlgmr.msra.gmra.mxu1 %vm2066_vm15, %v3433_v46  ;;  %3172 = vmatpush3.msra.mxu0 %v4276_v57 }
 0x26a   :  { %3173 = vmatprep.subr.mxu0 %v3425_v2  ;;  %3199 = vmatprep.mubr.msk.f32.mxu0 %vm3434_vm3, %v3425_v2 }
 0x26b   :  { %3174 = vmatpush3.msra.mxu0 %v4282_v58  ;;  %3202 = vmatprep.subr.mxu1 %v3425_v2 }
 0x26c   :  { %3175 = vmatprep.subr.mxu0 %v3425_v2  ;;  %3234 = vmatprep.mubr.msk.f32.mxu1 %vm3434_vm3, %v3425_v2 }
 0x26d   :  { %3176 = vmatpush3.msra.mxu0 %v4290_v60  ;;  %3280 = vset.pattern.permute.xlu0 %v3441_v40  ;;  %v2304_v60 = vld [vmem:[#allocation7 + $0x20] sm:$0xff] }
 0x26e   :  { %3177 = vmatprep.subr.mxu0 %v3425_v2  ;;  %3203 = vmatpush3.msra.mxu1 %v2315_v37 }
 0x26f   :  { %3178 = vmatpush3.msra.mxu0 %v4296_v61  ;;  %3204 = vmatprep.subr.mxu1 %v3425_v2 }
 0x270   :  { %3179 = vmatprep.subr.mxu0 %v3425_v2  ;;  %3205 = vmatpush3.msra.mxu1 %v2314_v38 }
 0x271   :  { %3180 = vmatpush3.msra.mxu0 %v4302_v63  ;;  %3206 = vmatprep.subr.mxu1 %v3425_v2 }
 0x272   :  { %3181 = vmatprep.subr.mxu0 %v3425_v2  ;;  %3207 = vmatpush3.msra.mxu1 %v2313_v42 }
 0x273   :  { %3182 = vmatpush3.msra.mxu0 %v4308_v0  ;;  %3208 = vmatprep.subr.mxu1 %v3425_v2  ;;  %v2303_v0 = vld [vmem:[#allocation7 + $0x18] sm:$0xff] }
 0x274   :  { %3183 = vmatprep.subr.mxu0 %v3425_v2 }
 0x275   :  { %3184 = vmatpush3.msra.mxu0 %v4315_v8 }
 0x276   :  { %3185 = vmatprep.subr.mxu0 %v3425_v2  ;;  %v1385_v30 = vpop.f32.mrf.mxu0 }
 0x277   :  { %3186 = vmatpush3.msra.mxu0 %v4323_v39  ;;  %v2302_v39 = vld [vmem:[#allocation7 + $0x10] sm:$0xff] }
 0x278   :  { %3187 = vmatprep.subr.mxu0 %v3425_v2  ;;  %v1387_v31 = vpop.f32.mrf.mxu0 }
 0x279   :  { %3188 = vmatpush3.msra.mxu0 %v4331_v4  ;;  %v1610_v32 = vadd.f32 %v1387_v31, %v1235_v22  ;;  %v2301_v4 = vld [vmem:[#allocation7 + $0x8] sm:$0xff]  ;;  %v2455_v22 = vld [vmem:[%s4849_s2] ss:$0 sm:$0xff] }
 0x27a   :  { %3189 = vmatprep.subr.mxu0 %v3425_v2 }
 0x27b   :  { %3190 = vmatpush3.msra.mxu0 %v4337_v6  ;;  %v2214_v26 = vpop.permute.xlu1 %2213  ;;  %v2300_v6 = vld [vmem:[#allocation7] sm:$0xff] }
 0x27c   :  { %3191 = vmatprep.subr.mxu0 %v3425_v2  ;;  %vm2215_vm0 = vcmp.eq.s32.totalorder %v3625_v44, %v2214_v26  ;;  %v2312_v44 = vld [vmem:[#allocation7 + $0x60] sm:$0xff] }
 0x27d   :  { %3192 = vmatpush3.msra.mxu0 %v4344_v7  ;;  %v1456_v25 = vpop.f32.mrf.mxu1  ;;  %3209 = vmatpush3.msra.mxu1 %v2312_v44 }
 0x27e   :  { %3193 = vmatprep.subr.mxu0 %v3425_v2  ;;  %v1461_v27 = vadd.f32 %v1460_v24, %v1456_v25  ;;  %3210 = vmatprep.subr.mxu1 %v3425_v2 }
 0x27f   :  { %3194 = vmatpush3.msra.mxu0 %v4353_v10  ;;  %v2991_v28 = vpop.f32.mrf.mxu1 }
 0x280   :  { %3195 = vmatprep.subr.mxu0 %v3425_v2  ;;  %v1462_v29 = vmax.f32 %v4755_v21, %v1461_v27  ;;  %v2456_v27 = vld [vmem:[%s4851_s4] ss:$0 sm:$0xff] }
 0x281   :  { %3196 = vmatpush3.msra.mxu0 %v4359_v41 }
 0x282   :  { %3197 = vmatprep.subr.mxu0 %v3425_v2 }
 0x283   :  { %3198 = vmatpush3.msra.mxu0 %v4366_v47 }
 0x284   :  { %3200 = vmatmul.mubr.msk.f32.vlgmr.msra.gmra.mxu0 %vm2215_vm0, %v3433_v46  ;;  %v2311_v46 = vld [vmem:[#allocation7 + $0x58] sm:$0xff] }
 0x285   :  { %3211 = vmatpush3.msra.mxu1 %v2311_v46 }
 0x286   :  { %3212 = vmatprep.subr.mxu1 %v3425_v2 }
 0x287   :  { %3213 = vmatpush3.msra.mxu1 %v2310_v45 }
 0x288   :  { %3214 = vmatprep.subr.mxu1 %v3425_v2 }
 0x289   :  { %3215 = vmatpush3.msra.mxu1 %v2309_v48 }
 0x28a   :  { %3216 = vmatprep.subr.mxu1 %v3425_v2 }
 0x28b   :  { %3217 = vmatpush3.msra.mxu1 %v2308_v50 }
 0x28c   :  { %3218 = vmatprep.subr.mxu1 %v3425_v2 }
 0x28d   :  { %3219 = vmatpush3.msra.mxu1 %v2307_v51 }
 0x28e   :  { %3220 = vmatprep.subr.mxu1 %v3425_v2 }
 0x28f   :  { %3221 = vmatpush3.msra.mxu1 %v2306_v53 }
 0x290   :  { %3222 = vmatprep.subr.mxu1 %v3425_v2 }
 0x291   :  { %3223 = vmatpush3.msra.mxu1 %v2305_v55 }
 0x292   :  { %3224 = vmatprep.subr.mxu1 %v3425_v2 }
 0x293   :  { %3225 = vmatpush3.msra.mxu1 %v2304_v60 }
 0x294   :  { %3226 = vmatprep.subr.mxu1 %v3425_v2 }
 0x295   :  { %3227 = vmatpush3.msra.mxu1 %v2303_v0 }
 0x296   :  { %3228 = vmatprep.subr.mxu1 %v3425_v2 }
 0x297   :  { %3229 = vmatpush3.msra.mxu1 %v2302_v39 }
 0x298   :  { %3230 = vmatprep.subr.mxu1 %v3425_v2 }
 0x299   :  { %v1535_v52 = vpop.f32.mrf.mxu0  ;;  %3231 = vmatpush3.msra.mxu1 %v2301_v4 }
 0x29a   :  { %3232 = vmatprep.subr.mxu1 %v3425_v2 }
 0x29b   :  { %v1537_v56 = vpop.f32.mrf.mxu0  ;;  %3233 = vmatpush3.msra.mxu1 %v2300_v6 }
 0x29c   :  { %v1760_v57 = vadd.f32 %v1537_v56, %v1385_v30 }
 0x2a0   :  { %v1606_v33 = vpop.f32.mrf.mxu1 }
 0x2a1   :  { %v1611_v34 = vadd.f32 %v1610_v32, %v1606_v33 }
 0x2a2   :  { %v3026_v35 = vpop.f32.mrf.mxu1 }
 0x2a3   :  { %v1612_v36 = vmax.f32 %v1462_v29, %v1611_v34 }
 0x2bc   :  { %v1685_v7 = vpop.f32.mrf.mxu0 }
 0x2be   :  { %v1687_v10 = vpop.f32.mrf.mxu0 }
 0x2bf   :  { %v1910_v41 = vadd.f32 %v1687_v10, %v1535_v52 }
 0x2c3   :  { %v1756_v58 = vpop.f32.mrf.mxu1 }
 0x2c4   :  { %v1761_v61 = vadd.f32 %v1760_v57, %v1756_v58 }
 0x2c5   :  { %v3061_v63 = vpop.f32.mrf.mxu1 }
 0x2c6   :  { %v1762_v8 = vmax.f32 %v1612_v36, %v1761_v61 }
 0x2df   :  { %v1835_v59 = vpop.f32.mrf.mxu0 }
 0x2e1   :  { %v1837_v62 = vpop.f32.mrf.mxu0 }
 0x2e2   :  { %v2060_v3 = vadd.f32 %v1837_v62, %v1685_v7 }
 0x2e5   :  { %v1906_v47 = vpop.f32.mrf.mxu1 }
 0x2e6   :  { %v1911_v40 = vadd.f32 %v1910_v41, %v1906_v47 }
 0x2e7   :  { %v3096_v13 = vpop.f32.mrf.mxu1 }
 0x2e8   :  { %v1912_v54 = vmax.f32 %v1762_v8, %v1911_v40 }
 0x301   :  { %v1985_v1 = vpop.f32.mrf.mxu0 }
 0x303   :  { %v1987_v9 = vpop.f32.mrf.mxu0 }
 0x304   :  { %v2209_v2 = vadd.f32 %v1987_v9, %v1835_v59 }
 0x307   :  { %v2056_v15 = vpop.f32.mrf.mxu1 }
 0x308   :  { %v2061_v11 = vadd.f32 %v2060_v3, %v2056_v15 }
 0x309   :  { %v3131_v49 = vpop.f32.mrf.mxu1 }
 0x30a   :  { %v2062_v17 = vmax.f32 %v1912_v54, %v2061_v11 }
 0x323   :  { %v2135_v5 = vpop.f32.mrf.mxu0 }
 0x325   :  { %v2136_v12 = vpop.f32.mrf.mxu0 }
 0x326   :  { %v2288_v18 = vadd.f32 %v2136_v12, %v1985_v1 }
 0x329   :  { %v2205_v16 = vpop.f32.mrf.mxu1 }
 0x32a   :  { %v2210_v14 = vadd.f32 %v2209_v2, %v2205_v16 }
 0x32b   :  { %v3166_v43 = vpop.f32.mrf.mxu1 }
 0x32c   :  { %v2211_v20 = vmax.f32 %v2062_v17, %v2210_v14 }
 0x344   :  { %v2284_v19 = vpop.f32.mrf.mxu0 }
 0x345   :  { %v2289_v21 = vadd.f32 %v2288_v18, %v2284_v19 }
 0x346   :  { %v3201_v23 = vpop.f32.mrf.mxu0 }
 0x347   :  { %v2290_v24 = vmax.f32 %v2211_v20, %v2289_v21 }
 0x349   :  { %v2298_v25 = vadd.f32 %v2455_v22, %v2290_v24 }
 0x34b   :  { %v2299_v26 = vmax.f32 %v2298_v25, 0.0 }
 0x34d   :  { %3235 = vmatmul.mubr.f32.vlgmr.msra.gmra.mxu1 %v2299_v26 }
 0x40d   :  { %v2389_v28 = vpop.f32.mrf.mxu1 }
 0x40e   :  { %v2390_v29 = vadd.f32 %v2456_v27, %v2389_v28 }
 0x40f   :  { %v3236_v30 = vpop.f32.mrf.mxu1 }
 0x410   :  { %2393 = vst [vmem:[#allocation8] sm:$0xff] %v2390_v29 }
 0x411   :  { %3401 = shalt.err (!%p3398_p5)
}
 0x412   :  { %2403 = dma.vmem_to_hbm [thread:$0]  %s2401_s14, 128, %s4852_s5, [#allocation4]  }
 0x413   :  { %3414 = dma.done.wait [#allocation4], 128  }
 0x414   :  { %3415 = vsyncadd [#allocation4], 4294967168 }
 0x415   :  { %2407 = vsyncpa [#allocation3], 1 }
 0x416   :  { %2408 = vsyncpa [#allocation6], 1 }
 0x417   :  { %2409 = vsyncpa [#allocation4], 1 }

</bundles_post_ra>
